<compile_context>
chip_gen: v7x
topology: tpu7x:2x2x1
jax: 0.10.0
libtpu: 0.0.40
codegen_flags: <defaults>
</compile_context>

<pallas_src>
import jax
import jax.numpy as jnp
import numpy as np
from jax.experimental import pallas as pl
from jax.experimental.pallas import tpu as pltpu


# ----------------------------------------------------------------------------
# Fused per-image kernel: conv1 -> pool/relu -> conv2 -> pool/relu -> fc
# ----------------------------------------------------------------------------
def _net_kernel(x_ref, w1b_ref, b1t_ref, w2b_ref, b2t_ref, w4_ref, bfc_ref,
                out_ref, pool1_ref):
    # ---- conv1 (banded matmuls) + 2x2 max-pool + ReLU -> pool1 (12, 128) ----
    # For output-row parity dh, accumulate over the 5 kh taps.  The banded
    # weight already contains both ow parities side by side (lanes 0:128 /
    # 128:256) and all kw taps, so pooling is just two elementwise maxes.
    pool1 = None
    for dh in range(2):
        acc = None
        for kh in range(5):
            lhs = x_ref[pl.ds(dh + kh, 12, stride=2), :]          # (12, 28)
            t = jnp.dot(lhs, w1b_ref[kh],
                        preferred_element_type=jnp.float32)       # (12, 256)
            acc = t if acc is None else acc + t
        cand = jnp.maximum(acc[:, 0:128], acc[:, 128:256])        # max over ow parity
        pool1 = cand if pool1 is None else jnp.maximum(pool1, cand)  # max over oh parity
    pool1 = jnp.maximum(pool1 + b1t_ref[...], 0.0)                # bias + ReLU
    pool1_ref[...] = pool1                                        # lanes = q*10 + c

    # ---- conv2 (banded matmuls) + 2x2 max-pool + ReLU -> pool2 (4, 128) ----
    pool2 = None
    for dh in range(2):
        acc = None
        for kh in range(5):
            lhs = pool1_ref[pl.ds(dh + kh, 4, stride=2), :]       # (4, 128)
            t = jnp.dot(lhs, w2b_ref[kh],
                        preferred_element_type=jnp.float32)       # (4, 256)
            acc = t if acc is None else acc + t
        cand = jnp.maximum(acc[:, 0:128], acc[:, 128:256])
        pool2 = cand if pool2 is None else jnp.maximum(pool2, cand)
    pool2 = jnp.maximum(pool2 + b2t_ref[...], 0.0)                # lanes = w*32 + c

    # ---- fc: NCHW flatten folded into the pre-permuted (4, 128, 10) weight --
    logits = bfc_ref[...]                                         # (1, 10)
    for h in range(4):
        logits = logits + jnp.dot(pool2[h:h + 1, :], w4_ref[h],
                                  preferred_element_type=jnp.float32)
    out_ref[...] = logits


def net_forward(x_nchw, prepped):
    """x_nchw: (B, 1, 28, 28) float32 -> logits (B, 10)."""
    B = x_nchw.shape[0]
    x = x_nchw.reshape(B, 28, 28)                                 # free reshape
    out = pl.pallas_call(
        _net_kernel,
        out_shape=jax.ShapeDtypeStruct((B, 1, 10), jnp.float32),
        grid_spec=pltpu.PrefetchScalarGridSpec(
            num_scalar_prefetch=0,
            grid=(B,),
            in_specs=[
                pl.BlockSpec((None, 28, 28), lambda b: (b, 0, 0)),   # image
                pl.BlockSpec((5, 28, 256), lambda b: (0, 0, 0)),     # w1 banded
                pl.BlockSpec((1, 128), lambda b: (0, 0)),            # b1 tiled
                pl.BlockSpec((5, 128, 256), lambda b: (0, 0, 0)),    # w2 banded
                pl.BlockSpec((1, 128), lambda b: (0, 0)),            # b2 tiled
                pl.BlockSpec((4, 128, 10), lambda b: (0, 0, 0)),     # fc weight
                pl.BlockSpec((1, 10), lambda b: (0, 0)),             # fc bias
            ],
            out_specs=pl.BlockSpec((None, 1, 10), lambda b: (b, 0, 0)),
            scratch_shapes=[pltpu.VMEM((12, 128), jnp.float32)],     # pool1
        ),
        compiler_params=pltpu.CompilerParams(
            dimension_semantics=("parallel",)),
    )(x, prepped["w1b"], prepped["b1t"], prepped["w2b"], prepped["b2t"],
      prepped["w4"], prepped["bfc"])
    return out.reshape(B, 10)


# ----------------------------------------------------------------------------
# One-time host-side weight preparation (amortized; removes all in-loop
# transposes / im2col / flatten re-layouts from the hot path).
# ----------------------------------------------------------------------------
def prepare_params(params):
    w1 = np.asarray(params["w1"], np.float32)    # (10, 1, 5, 5)
    b1 = np.asarray(params["b1"], np.float32)    # (10,)
    w2 = np.asarray(params["w2"], np.float32)    # (20, 10, 5, 5)
    b2 = np.asarray(params["b2"], np.float32)    # (20,)
    wfc = np.asarray(params["wfc"], np.float32)  # (10, 320)
    bfc = np.asarray(params["bfc"], np.float32)  # (10,)

    C1, C2, C2P, NCLS = 10, 20, 32, 10

    # conv1 banded weight: [kh, iw, dw*128 + q*10 + oc] = w1[oc, 0, kh, iw-2q-dw]
    w1b = np.zeros((5, 28, 256), np.float32)
    for kh in range(5):
        for dw in range(2):
            for q in range(12):
                for kw in range(5):
                    iw = 2 * q + dw + kw
                    w1b[kh, iw, dw * 128 + q * C1: dw * 128 + (q + 1) * C1] = \
                        w1[:, 0, kh, kw]
    b1t = np.zeros((1, 128), np.float32)
    b1t[0, :12 * C1] = np.tile(b1, 12)

    # conv2 banded weight: [kh, q*10+c, dw*128 + w*32 + oc] = w2[oc, c, kh, q-2w-dw]
    w2b = np.zeros((5, 128, 256), np.float32)
    for kh in range(5):
        for dw in range(2):
            for wo in range(4):
                for kw in range(5):
                    q = 2 * wo + dw + kw
                    w2b[kh, q * C1:(q + 1) * C1,
                        dw * 128 + wo * C2P: dw * 128 + wo * C2P + C2] = \
                        w2[:, :, kh, kw].T
    b2t = np.zeros((1, 128), np.float32)
    for wo in range(4):
        b2t[0, wo * C2P: wo * C2P + C2] = b2

    # fc weight permuted to the kernel's pool2 layout (h rows, w*32+oc lanes),
    # matching PyTorch's NCHW flatten order oc*16 + h*4 + w.
    w4 = np.zeros((4, 128, NCLS), np.float32)
    for h in range(4):
        for w in range(4):
            for oc in range(C2):
                w4[h, w * C2P + oc, :] = wfc[:, oc * 16 + h * 4 + w]
    bfct = bfc.reshape(1, NCLS)

    return {
        "w1b": jnp.asarray(w1b), "b1t": jnp.asarray(b1t),
        "w2b": jnp.asarray(w2b), "b2t": jnp.asarray(b2t),
        "w4": jnp.asarray(w4), "bfc": jnp.asarray(bfct),
    }


# ----------------------------------------------------------------------------
# Pure-JAX reference (mirrors the PyTorch module) for a correctness check.
# ----------------------------------------------------------------------------
def reference_forward(x_nchw, params):
    def conv(x_nhwc, w, b):
        OC, IC, KH, KW = w.shape
        B, H, W, _ = x_nhwc.shape
        OH, OW = H - KH + 1, W - KW + 1
        cols = []
        for kh in range(KH):
            for kw in range(KW):
                cols.append(x_nhwc[:, kh:kh + OH, kw:kw + OW, :])
        patches = jnp.concatenate(cols, axis=-1).reshape(B * OH * OW, KH * KW * IC)
        wmat = jnp.transpose(w, (2, 3, 1, 0)).reshape(KH * KW * IC, OC)
        return (patches @ wmat + b).reshape(B, OH, OW, OC)

    def pool_relu(x):
        m = jnp.maximum(jnp.maximum(x[:, 0::2, 0::2, :], x[:, 0::2, 1::2, :]),
                        jnp.maximum(x[:, 1::2, 0::2, :], x[:, 1::2, 1::2, :]))
        return jnp.maximum(m, 0.0)

    B = x_nchw.shape[0]
    x = jnp.transpose(x_nchw, (0, 2, 3, 1))
    x = pool_relu(conv(x, params["w1"], params["b1"]))
    x = pool_relu(conv(x, params["w2"], params["b2"]))
    x = jnp.transpose(x, (0, 3, 1, 2)).reshape(B, -1)
    return x @ params["wfc"].T + params["bfc"]


# ----------------------------------------------------------------------------
# Deterministic parameter init (PyTorch default U(-1/sqrt(fan_in), +))
# ----------------------------------------------------------------------------
def init_params(key):
    ks = jax.random.split(key, 6)

    def u(k, shape, fan_in):
        bound = 1.0 / jnp.sqrt(float(fan_in))
        return jax.random.uniform(k, shape, jnp.float32, -bound, bound)

    return {
        "w1": u(ks[0], (10, 1, 5, 5), 1 * 5 * 5),
        "b1": u(ks[1], (10,), 1 * 5 * 5),
        "w2": u(ks[2], (20, 10, 5, 5), 10 * 5 * 5),
        "b2": u(ks[3], (20,), 10 * 5 * 5),
        "wfc": u(ks[4], (10, 320), 320),
        "bfc": u(ks[5], (10,), 320),
    }


if __name__ == "__main__":
    key = jax.random.PRNGKey(0)
    kx, kp = jax.random.split(key)
    # fc(320, 10) implies 28x28 single-channel input (MNIST); small batch = 2.
    x = jax.random.normal(kx, (2, 1, 28, 28), jnp.float32)
    params = init_params(kp)
    prepped = prepare_params(params)      # one-time weight re-layout (amortized)

    fwd = jax.jit(net_forward)
    out = jax.block_until_ready(fwd(x, prepped))
    assert out.shape == (2, 10) and out.dtype == jnp.float32

    ref = jax.block_until_ready(reference_forward(x, params))
    if not jnp.allclose(out, ref, atol=1e-3, rtol=1e-3):
        max_err = float(jnp.max(jnp.abs(out - ref)))
        raise AssertionError(f"Pallas output mismatch vs reference, max|err|={max_err}")

    print("KERNEL_OK")
</pallas_src>

<mosaic_0001>
module attributes {stable_mosaic.version = 11 : i64} {
  func.func @_net_kernel(%arg0: i32, %arg1: memref<1x28x28xf32, #tpu.memory_space<vmem>>, %arg2: memref<5x28x256xf32, #tpu.memory_space<vmem>>, %arg3: memref<1x128xf32, #tpu.memory_space<vmem>>, %arg4: memref<5x128x256xf32, #tpu.memory_space<vmem>>, %arg5: memref<1x128xf32, #tpu.memory_space<vmem>>, %arg6: memref<4x128x10xf32, #tpu.memory_space<vmem>>, %arg7: memref<1x10xf32, #tpu.memory_space<vmem>>, %arg8: memref<1x1x10xf32, #tpu.memory_space<vmem>>, %arg9: memref<12x128xf32, #tpu.memory_space<vmem>>) attributes {dimension_semantics = [#tpu.dimension_semantics<parallel>], iteration_bounds = array<i64: 2>, scalar_prefetch = 0 : i64, scratch_operands = 1 : i64, tpu.core_type = #tpu.core_type<tc>, window_params = [{transform_indices = @transform_0, window_bounds = array<i64: 1, 28, 28>}, {pipeline_mode = #tpu.pipeline_mode<synchronous>, transform_indices = @transform_1, window_bounds = array<i64: 5, 28, 256>}, {pipeline_mode = #tpu.pipeline_mode<synchronous>, transform_indices = @transform_2, window_bounds = array<i64: 1, 128>}, {pipeline_mode = #tpu.pipeline_mode<synchronous>, transform_indices = @transform_3, window_bounds = array<i64: 5, 128, 256>}, {pipeline_mode = #tpu.pipeline_mode<synchronous>, transform_indices = @transform_4, window_bounds = array<i64: 1, 128>}, {pipeline_mode = #tpu.pipeline_mode<synchronous>, transform_indices = @transform_5, window_bounds = array<i64: 4, 128, 10>}, {pipeline_mode = #tpu.pipeline_mode<synchronous>, transform_indices = @transform_6, window_bounds = array<i64: 1, 10>}, {transform_indices = @transform_7, window_bounds = array<i64: 1, 1, 10>}]} {
    %c0 = arith.constant 0 : index
    %c0_0 = arith.constant 0 : index
    %c0_1 = arith.constant 0 : index
    %0 = tpu.strided_load %arg1[%c0, %c0_0, %c0_1] {strides = array<i32: 1, 2, 1>} : memref<1x28x28xf32, #tpu.memory_space<vmem>>, vector<1x12x28xf32>
    %1 = vector.shape_cast %0 : vector<1x12x28xf32> to vector<12x28xf32>
    %c0_2 = arith.constant 0 : index
    %c0_3 = arith.constant 0 : index
    %c0_4 = arith.constant 0 : index
    %2 = vector.load %arg2[%c0_2, %c0_3, %c0_4] : memref<5x28x256xf32, #tpu.memory_space<vmem>>, vector<1x28x256xf32>
    %3 = vector.shape_cast %2 : vector<1x28x256xf32> to vector<28x256xf32>
    %cst = arith.constant dense<0.000000e+00> : vector<12x256xf32>
    %4 = tpu.matmul %1, %3, %cst {dimension_numbers = #tpu.dot_dimension_numbers<[1], [0], [0], [1], [0, 0, 1, 1], [], []>} : vector<12x28xf32>, vector<28x256xf32>, vector<12x256xf32> -> vector<12x256xf32>
    %c0_5 = arith.constant 0 : index
    %c1 = arith.constant 1 : index
    %c0_6 = arith.constant 0 : index
    %5 = tpu.strided_load %arg1[%c0_5, %c1, %c0_6] {strides = array<i32: 1, 2, 1>} : memref<1x28x28xf32, #tpu.memory_space<vmem>>, vector<1x12x28xf32>
    %6 = vector.shape_cast %5 : vector<1x12x28xf32> to vector<12x28xf32>
    %c1_7 = arith.constant 1 : index
    %c0_8 = arith.constant 0 : index
    %c0_9 = arith.constant 0 : index
    %7 = vector.load %arg2[%c1_7, %c0_8, %c0_9] : memref<5x28x256xf32, #tpu.memory_space<vmem>>, vector<1x28x256xf32>
    %8 = vector.shape_cast %7 : vector<1x28x256xf32> to vector<28x256xf32>
    %cst_10 = arith.constant dense<0.000000e+00> : vector<12x256xf32>
    %9 = tpu.matmul %6, %8, %cst_10 {dimension_numbers = #tpu.dot_dimension_numbers<[1], [0], [0], [1], [0, 0, 1, 1], [], []>} : vector<12x28xf32>, vector<28x256xf32>, vector<12x256xf32> -> vector<12x256xf32>
    %10 = arith.addf %4, %9 : vector<12x256xf32>
    %c0_11 = arith.constant 0 : index
    %c2 = arith.constant 2 : index
    %c0_12 = arith.constant 0 : index
    %11 = tpu.strided_load %arg1[%c0_11, %c2, %c0_12] {strides = array<i32: 1, 2, 1>} : memref<1x28x28xf32, #tpu.memory_space<vmem>>, vector<1x12x28xf32>
    %12 = vector.shape_cast %11 : vector<1x12x28xf32> to vector<12x28xf32>
    %c2_13 = arith.constant 2 : index
    %c0_14 = arith.constant 0 : index
    %c0_15 = arith.constant 0 : index
    %13 = vector.load %arg2[%c2_13, %c0_14, %c0_15] : memref<5x28x256xf32, #tpu.memory_space<vmem>>, vector<1x28x256xf32>
    %14 = vector.shape_cast %13 : vector<1x28x256xf32> to vector<28x256xf32>
    %cst_16 = arith.constant dense<0.000000e+00> : vector<12x256xf32>
    %15 = tpu.matmul %12, %14, %cst_16 {dimension_numbers = #tpu.dot_dimension_numbers<[1], [0], [0], [1], [0, 0, 1, 1], [], []>} : vector<12x28xf32>, vector<28x256xf32>, vector<12x256xf32> -> vector<12x256xf32>
    %16 = arith.addf %10, %15 : vector<12x256xf32>
    %c0_17 = arith.constant 0 : index
    %c3 = arith.constant 3 : index
    %c0_18 = arith.constant 0 : index
    %17 = tpu.strided_load %arg1[%c0_17, %c3, %c0_18] {strides = array<i32: 1, 2, 1>} : memref<1x28x28xf32, #tpu.memory_space<vmem>>, vector<1x12x28xf32>
    %18 = vector.shape_cast %17 : vector<1x12x28xf32> to vector<12x28xf32>
    %c3_19 = arith.constant 3 : index
    %c0_20 = arith.constant 0 : index
    %c0_21 = arith.constant 0 : index
    %19 = vector.load %arg2[%c3_19, %c0_20, %c0_21] : memref<5x28x256xf32, #tpu.memory_space<vmem>>, vector<1x28x256xf32>
    %20 = vector.shape_cast %19 : vector<1x28x256xf32> to vector<28x256xf32>
    %cst_22 = arith.constant dense<0.000000e+00> : vector<12x256xf32>
    %21 = tpu.matmul %18, %20, %cst_22 {dimension_numbers = #tpu.dot_dimension_numbers<[1], [0], [0], [1], [0, 0, 1, 1], [], []>} : vector<12x28xf32>, vector<28x256xf32>, vector<12x256xf32> -> vector<12x256xf32>
    %22 = arith.addf %16, %21 : vector<12x256xf32>
    %c0_23 = arith.constant 0 : index
    %c4 = arith.constant 4 : index
    %c0_24 = arith.constant 0 : index
    %23 = tpu.strided_load %arg1[%c0_23, %c4, %c0_24] {strides = array<i32: 1, 2, 1>} : memref<1x28x28xf32, #tpu.memory_space<vmem>>, vector<1x12x28xf32>
    %24 = vector.shape_cast %23 : vector<1x12x28xf32> to vector<12x28xf32>
    %c4_25 = arith.constant 4 : index
    %c0_26 = arith.constant 0 : index
    %c0_27 = arith.constant 0 : index
    %25 = vector.load %arg2[%c4_25, %c0_26, %c0_27] : memref<5x28x256xf32, #tpu.memory_space<vmem>>, vector<1x28x256xf32>
    %26 = vector.shape_cast %25 : vector<1x28x256xf32> to vector<28x256xf32>
    %cst_28 = arith.constant dense<0.000000e+00> : vector<12x256xf32>
    %27 = tpu.matmul %24, %26, %cst_28 {dimension_numbers = #tpu.dot_dimension_numbers<[1], [0], [0], [1], [0, 0, 1, 1], [], []>} : vector<12x28xf32>, vector<28x256xf32>, vector<12x256xf32> -> vector<12x256xf32>
    %28 = arith.addf %22, %27 : vector<12x256xf32>
    %29 = vector.extract_strided_slice %28 {offsets = [0, 0], sizes = [12, 128], strides = [1, 1]} : vector<12x256xf32> to vector<12x128xf32>
    %30 = vector.extract_strided_slice %28 {offsets = [0, 128], sizes = [12, 128], strides = [1, 1]} : vector<12x256xf32> to vector<12x128xf32>
    %31 = arith.maximumf %29, %30 : vector<12x128xf32>
    %c0_29 = arith.constant 0 : index
    %c1_30 = arith.constant 1 : index
    %c0_31 = arith.constant 0 : index
    %32 = tpu.strided_load %arg1[%c0_29, %c1_30, %c0_31] {strides = array<i32: 1, 2, 1>} : memref<1x28x28xf32, #tpu.memory_space<vmem>>, vector<1x12x28xf32>
    %33 = vector.shape_cast %32 : vector<1x12x28xf32> to vector<12x28xf32>
    %c0_32 = arith.constant 0 : index
    %c0_33 = arith.constant 0 : index
    %c0_34 = arith.constant 0 : index
    %34 = vector.load %arg2[%c0_32, %c0_33, %c0_34] : memref<5x28x256xf32, #tpu.memory_space<vmem>>, vector<1x28x256xf32>
    %35 = vector.shape_cast %34 : vector<1x28x256xf32> to vector<28x256xf32>
    %cst_35 = arith.constant dense<0.000000e+00> : vector<12x256xf32>
    %36 = tpu.matmul %33, %35, %cst_35 {dimension_numbers = #tpu.dot_dimension_numbers<[1], [0], [0], [1], [0, 0, 1, 1], [], []>} : vector<12x28xf32>, vector<28x256xf32>, vector<12x256xf32> -> vector<12x256xf32>
    %c0_36 = arith.constant 0 : index
    %c2_37 = arith.constant 2 : index
    %c0_38 = arith.constant 0 : index
    %37 = tpu.strided_load %arg1[%c0_36, %c2_37, %c0_38] {strides = array<i32: 1, 2, 1>} : memref<1x28x28xf32, #tpu.memory_space<vmem>>, vector<1x12x28xf32>
    %38 = vector.shape_cast %37 : vector<1x12x28xf32> to vector<12x28xf32>
    %c1_39 = arith.constant 1 : index
    %c0_40 = arith.constant 0 : index
    %c0_41 = arith.constant 0 : index
    %39 = vector.load %arg2[%c1_39, %c0_40, %c0_41] : memref<5x28x256xf32, #tpu.memory_space<vmem>>, vector<1x28x256xf32>
    %40 = vector.shape_cast %39 : vector<1x28x256xf32> to vector<28x256xf32>
    %cst_42 = arith.constant dense<0.000000e+00> : vector<12x256xf32>
    %41 = tpu.matmul %38, %40, %cst_42 {dimension_numbers = #tpu.dot_dimension_numbers<[1], [0], [0], [1], [0, 0, 1, 1], [], []>} : vector<12x28xf32>, vector<28x256xf32>, vector<12x256xf32> -> vector<12x256xf32>
    %42 = arith.addf %36, %41 : vector<12x256xf32>
    %c0_43 = arith.constant 0 : index
    %c3_44 = arith.constant 3 : index
    %c0_45 = arith.constant 0 : index
    %43 = tpu.strided_load %arg1[%c0_43, %c3_44, %c0_45] {strides = array<i32: 1, 2, 1>} : memref<1x28x28xf32, #tpu.memory_space<vmem>>, vector<1x12x28xf32>
    %44 = vector.shape_cast %43 : vector<1x12x28xf32> to vector<12x28xf32>
    %c2_46 = arith.constant 2 : index
    %c0_47 = arith.constant 0 : index
    %c0_48 = arith.constant 0 : index
    %45 = vector.load %arg2[%c2_46, %c0_47, %c0_48] : memref<5x28x256xf32, #tpu.memory_space<vmem>>, vector<1x28x256xf32>
    %46 = vector.shape_cast %45 : vector<1x28x256xf32> to vector<28x256xf32>
    %cst_49 = arith.constant dense<0.000000e+00> : vector<12x256xf32>
    %47 = tpu.matmul %44, %46, %cst_49 {dimension_numbers = #tpu.dot_dimension_numbers<[1], [0], [0], [1], [0, 0, 1, 1], [], []>} : vector<12x28xf32>, vector<28x256xf32>, vector<12x256xf32> -> vector<12x256xf32>
    %48 = arith.addf %42, %47 : vector<12x256xf32>
    %c0_50 = arith.constant 0 : index
    %c4_51 = arith.constant 4 : index
    %c0_52 = arith.constant 0 : index
    %49 = tpu.strided_load %arg1[%c0_50, %c4_51, %c0_52] {strides = array<i32: 1, 2, 1>} : memref<1x28x28xf32, #tpu.memory_space<vmem>>, vector<1x12x28xf32>
    %50 = vector.shape_cast %49 : vector<1x12x28xf32> to vector<12x28xf32>
    %c3_53 = arith.constant 3 : index
    %c0_54 = arith.constant 0 : index
    %c0_55 = arith.constant 0 : index
    %51 = vector.load %arg2[%c3_53, %c0_54, %c0_55] : memref<5x28x256xf32, #tpu.memory_space<vmem>>, vector<1x28x256xf32>
    %52 = vector.shape_cast %51 : vector<1x28x256xf32> to vector<28x256xf32>
    %cst_56 = arith.constant dense<0.000000e+00> : vector<12x256xf32>
    %53 = tpu.matmul %50, %52, %cst_56 {dimension_numbers = #tpu.dot_dimension_numbers<[1], [0], [0], [1], [0, 0, 1, 1], [], []>} : vector<12x28xf32>, vector<28x256xf32>, vector<12x256xf32> -> vector<12x256xf32>
    %54 = arith.addf %48, %53 : vector<12x256xf32>
    %c0_57 = arith.constant 0 : index
    %c5 = arith.constant 5 : index
    %c0_58 = arith.constant 0 : index
    %55 = tpu.strided_load %arg1[%c0_57, %c5, %c0_58] {strides = array<i32: 1, 2, 1>} : memref<1x28x28xf32, #tpu.memory_space<vmem>>, vector<1x12x28xf32>
    %56 = vector.shape_cast %55 : vector<1x12x28xf32> to vector<12x28xf32>
    %c4_59 = arith.constant 4 : index
    %c0_60 = arith.constant 0 : index
    %c0_61 = arith.constant 0 : index
    %57 = vector.load %arg2[%c4_59, %c0_60, %c0_61] : memref<5x28x256xf32, #tpu.memory_space<vmem>>, vector<1x28x256xf32>
    %58 = vector.shape_cast %57 : vector<1x28x256xf32> to vector<28x256xf32>
    %cst_62 = arith.constant dense<0.000000e+00> : vector<12x256xf32>
    %59 = tpu.matmul %56, %58, %cst_62 {dimension_numbers = #tpu.dot_dimension_numbers<[1], [0], [0], [1], [0, 0, 1, 1], [], []>} : vector<12x28xf32>, vector<28x256xf32>, vector<12x256xf32> -> vector<12x256xf32>
    %60 = arith.addf %54, %59 : vector<12x256xf32>
    %61 = vector.extract_strided_slice %60 {offsets = [0, 0], sizes = [12, 128], strides = [1, 1]} : vector<12x256xf32> to vector<12x128xf32>
    %62 = vector.extract_strided_slice %60 {offsets = [0, 128], sizes = [12, 128], strides = [1, 1]} : vector<12x256xf32> to vector<12x128xf32>
    %63 = arith.maximumf %61, %62 : vector<12x128xf32>
    %64 = arith.maximumf %31, %63 : vector<12x128xf32>
    %c0_63 = arith.constant 0 : index
    %c0_64 = arith.constant 0 : index
    %65 = vector.load %arg3[%c0_63, %c0_64] : memref<1x128xf32, #tpu.memory_space<vmem>>, vector<1x128xf32>
    %66 = vector.broadcast %65 : vector<1x128xf32> to vector<12x128xf32>
    %67 = arith.addf %64, %66 : vector<12x128xf32>
    %cst_65 = arith.constant 0.000000e+00 : f32
    %68 = vector.broadcast %cst_65 : f32 to vector<12x128xf32>
    %69 = arith.maximumf %67, %68 : vector<12x128xf32>
    %c0_66 = arith.constant 0 : index
    %c0_67 = arith.constant 0 : index
    %70 = vector.load %arg9[%c0_66, %c0_67] : memref<12x128xf32, #tpu.memory_space<vmem>>, vector<12x128xf32>
    tpu.vector_store %arg9[%c0_66, %c0_67], %69 {strides = array<i32>} : memref<12x128xf32, #tpu.memory_space<vmem>>, vector<12x128xf32>,
    %c0_68 = arith.constant 0 : index
    %c0_69 = arith.constant 0 : index
    %71 = tpu.strided_load %arg9[%c0_68, %c0_69] {strides = array<i32: 2, 1>} : memref<12x128xf32, #tpu.memory_space<vmem>>, vector<4x128xf32>
    %c0_70 = arith.constant 0 : index
    %c0_71 = arith.constant 0 : index
    %c0_72 = arith.constant 0 : index
    %72 = vector.load %arg4[%c0_70, %c0_71, %c0_72] : memref<5x128x256xf32, #tpu.memory_space<vmem>>, vector<1x128x256xf32>
    %73 = vector.shape_cast %72 : vector<1x128x256xf32> to vector<128x256xf32>
    %cst_73 = arith.constant dense<0.000000e+00> : vector<4x256xf32>
    %74 = tpu.matmul %71, %73, %cst_73 {dimension_numbers = #tpu.dot_dimension_numbers<[1], [0], [0], [1], [0, 0, 1, 1], [], []>} : vector<4x128xf32>, vector<128x256xf32>, vector<4x256xf32> -> vector<4x256xf32>
    %c1_74 = arith.constant 1 : index
    %c0_75 = arith.constant 0 : index
    %75 = tpu.strided_load %arg9[%c1_74, %c0_75] {strides = array<i32: 2, 1>} : memref<12x128xf32, #tpu.memory_space<vmem>>, vector<4x128xf32>
    %c1_76 = arith.constant 1 : index
    %c0_77 = arith.constant 0 : index
    %c0_78 = arith.constant 0 : index
    %76 = vector.load %arg4[%c1_76, %c0_77, %c0_78] : memref<5x128x256xf32, #tpu.memory_space<vmem>>, vector<1x128x256xf32>
    %77 = vector.shape_cast %76 : vector<1x128x256xf32> to vector<128x256xf32>
    %cst_79 = arith.constant dense<0.000000e+00> : vector<4x256xf32>
    %78 = tpu.matmul %75, %77, %cst_79 {dimension_numbers = #tpu.dot_dimension_numbers<[1], [0], [0], [1], [0, 0, 1, 1], [], []>} : vector<4x128xf32>, vector<128x256xf32>, vector<4x256xf32> -> vector<4x256xf32>
    %79 = arith.addf %74, %78 : vector<4x256xf32>
    %c2_80 = arith.constant 2 : index
    %c0_81 = arith.constant 0 : index
    %80 = tpu.strided_load %arg9[%c2_80, %c0_81] {strides = array<i32: 2, 1>} : memref<12x128xf32, #tpu.memory_space<vmem>>, vector<4x128xf32>
    %c2_82 = arith.constant 2 : index
    %c0_83 = arith.constant 0 : index
    %c0_84 = arith.constant 0 : index
    %81 = vector.load %arg4[%c2_82, %c0_83, %c0_84] : memref<5x128x256xf32, #tpu.memory_space<vmem>>, vector<1x128x256xf32>
    %82 = vector.shape_cast %81 : vector<1x128x256xf32> to vector<128x256xf32>
    %cst_85 = arith.constant dense<0.000000e+00> : vector<4x256xf32>
    %83 = tpu.matmul %80, %82, %cst_85 {dimension_numbers = #tpu.dot_dimension_numbers<[1], [0], [0], [1], [0, 0, 1, 1], [], []>} : vector<4x128xf32>, vector<128x256xf32>, vector<4x256xf32> -> vector<4x256xf32>
    %84 = arith.addf %79, %83 : vector<4x256xf32>
    %c3_86 = arith.constant 3 : index
    %c0_87 = arith.constant 0 : index
    %85 = tpu.strided_load %arg9[%c3_86, %c0_87] {strides = array<i32: 2, 1>} : memref<12x128xf32, #tpu.memory_space<vmem>>, vector<4x128xf32>
    %c3_88 = arith.constant 3 : index
    %c0_89 = arith.constant 0 : index
    %c0_90 = arith.constant 0 : index
    %86 = vector.load %arg4[%c3_88, %c0_89, %c0_90] : memref<5x128x256xf32, #tpu.memory_space<vmem>>, vector<1x128x256xf32>
    %87 = vector.shape_cast %86 : vector<1x128x256xf32> to vector<128x256xf32>
    %cst_91 = arith.constant dense<0.000000e+00> : vector<4x256xf32>
    %88 = tpu.matmul %85, %87, %cst_91 {dimension_numbers = #tpu.dot_dimension_numbers<[1], [0], [0], [1], [0, 0, 1, 1], [], []>} : vector<4x128xf32>, vector<128x256xf32>, vector<4x256xf32> -> vector<4x256xf32>
    %89 = arith.addf %84, %88 : vector<4x256xf32>
    %c4_92 = arith.constant 4 : index
    %c0_93 = arith.constant 0 : index
    %90 = tpu.strided_load %arg9[%c4_92, %c0_93] {strides = array<i32: 2, 1>} : memref<12x128xf32, #tpu.memory_space<vmem>>, vector<4x128xf32>
    %c4_94 = arith.constant 4 : index
    %c0_95 = arith.constant 0 : index
    %c0_96 = arith.constant 0 : index
    %91 = vector.load %arg4[%c4_94, %c0_95, %c0_96] : memref<5x128x256xf32, #tpu.memory_space<vmem>>, vector<1x128x256xf32>
    %92 = vector.shape_cast %91 : vector<1x128x256xf32> to vector<128x256xf32>
    %cst_97 = arith.constant dense<0.000000e+00> : vector<4x256xf32>
    %93 = tpu.matmul %90, %92, %cst_97 {dimension_numbers = #tpu.dot_dimension_numbers<[1], [0], [0], [1], [0, 0, 1, 1], [], []>} : vector<4x128xf32>, vector<128x256xf32>, vector<4x256xf32> -> vector<4x256xf32>
    %94 = arith.addf %89, %93 : vector<4x256xf32>
    %95 = vector.extract_strided_slice %94 {offsets = [0, 0], sizes = [4, 128], strides = [1, 1]} : vector<4x256xf32> to vector<4x128xf32>
    %96 = vector.extract_strided_slice %94 {offsets = [0, 128], sizes = [4, 128], strides = [1, 1]} : vector<4x256xf32> to vector<4x128xf32>
    %97 = arith.maximumf %95, %96 : vector<4x128xf32>
    %c1_98 = arith.constant 1 : index
    %c0_99 = arith.constant 0 : index
    %98 = tpu.strided_load %arg9[%c1_98, %c0_99] {strides = array<i32: 2, 1>} : memref<12x128xf32, #tpu.memory_space<vmem>>, vector<4x128xf32>
    %c0_100 = arith.constant 0 : index
    %c0_101 = arith.constant 0 : index
    %c0_102 = arith.constant 0 : index
    %99 = vector.load %arg4[%c0_100, %c0_101, %c0_102] : memref<5x128x256xf32, #tpu.memory_space<vmem>>, vector<1x128x256xf32>
    %100 = vector.shape_cast %99 : vector<1x128x256xf32> to vector<128x256xf32>
    %cst_103 = arith.constant dense<0.000000e+00> : vector<4x256xf32>
    %101 = tpu.matmul %98, %100, %cst_103 {dimension_numbers = #tpu.dot_dimension_numbers<[1], [0], [0], [1], [0, 0, 1, 1], [], []>} : vector<4x128xf32>, vector<128x256xf32>, vector<4x256xf32> -> vector<4x256xf32>
    %c2_104 = arith.constant 2 : index
    %c0_105 = arith.constant 0 : index
    %102 = tpu.strided_load %arg9[%c2_104, %c0_105] {strides = array<i32: 2, 1>} : memref<12x128xf32, #tpu.memory_space<vmem>>, vector<4x128xf32>
    %c1_106 = arith.constant 1 : index
    %c0_107 = arith.constant 0 : index
    %c0_108 = arith.constant 0 : index
    %103 = vector.load %arg4[%c1_106, %c0_107, %c0_108] : memref<5x128x256xf32, #tpu.memory_space<vmem>>, vector<1x128x256xf32>
    %104 = vector.shape_cast %103 : vector<1x128x256xf32> to vector<128x256xf32>
    %cst_109 = arith.constant dense<0.000000e+00> : vector<4x256xf32>
    %105 = tpu.matmul %102, %104, %cst_109 {dimension_numbers = #tpu.dot_dimension_numbers<[1], [0], [0], [1], [0, 0, 1, 1], [], []>} : vector<4x128xf32>, vector<128x256xf32>, vector<4x256xf32> -> vector<4x256xf32>
    %106 = arith.addf %101, %105 : vector<4x256xf32>
    %c3_110 = arith.constant 3 : index
    %c0_111 = arith.constant 0 : index
    %107 = tpu.strided_load %arg9[%c3_110, %c0_111] {strides = array<i32: 2, 1>} : memref<12x128xf32, #tpu.memory_space<vmem>>, vector<4x128xf32>
    %c2_112 = arith.constant 2 : index
    %c0_113 = arith.constant 0 : index
    %c0_114 = arith.constant 0 : index
    %108 = vector.load %arg4[%c2_112, %c0_113, %c0_114] : memref<5x128x256xf32, #tpu.memory_space<vmem>>, vector<1x128x256xf32>
    %109 = vector.shape_cast %108 : vector<1x128x256xf32> to vector<128x256xf32>
    %cst_115 = arith.constant dense<0.000000e+00> : vector<4x256xf32>
    %110 = tpu.matmul %107, %109, %cst_115 {dimension_numbers = #tpu.dot_dimension_numbers<[1], [0], [0], [1], [0, 0, 1, 1], [], []>} : vector<4x128xf32>, vector<128x256xf32>, vector<4x256xf32> -> vector<4x256xf32>
    %111 = arith.addf %106, %110 : vector<4x256xf32>
    %c4_116 = arith.constant 4 : index
    %c0_117 = arith.constant 0 : index
    %112 = tpu.strided_load %arg9[%c4_116, %c0_117] {strides = array<i32: 2, 1>} : memref<12x128xf32, #tpu.memory_space<vmem>>, vector<4x128xf32>
    %c3_118 = arith.constant 3 : index
    %c0_119 = arith.constant 0 : index
    %c0_120 = arith.constant 0 : index
    %113 = vector.load %arg4[%c3_118, %c0_119, %c0_120] : memref<5x128x256xf32, #tpu.memory_space<vmem>>, vector<1x128x256xf32>
    %114 = vector.shape_cast %113 : vector<1x128x256xf32> to vector<128x256xf32>
    %cst_121 = arith.constant dense<0.000000e+00> : vector<4x256xf32>
    %115 = tpu.matmul %112, %114, %cst_121 {dimension_numbers = #tpu.dot_dimension_numbers<[1], [0], [0], [1], [0, 0, 1, 1], [], []>} : vector<4x128xf32>, vector<128x256xf32>, vector<4x256xf32> -> vector<4x256xf32>
    %116 = arith.addf %111, %115 : vector<4x256xf32>
    %c5_122 = arith.constant 5 : index
    %c0_123 = arith.constant 0 : index
    %117 = tpu.strided_load %arg9[%c5_122, %c0_123] {strides = array<i32: 2, 1>} : memref<12x128xf32, #tpu.memory_space<vmem>>, vector<4x128xf32>
    %c4_124 = arith.constant 4 : index
    %c0_125 = arith.constant 0 : index
    %c0_126 = arith.constant 0 : index
    %118 = vector.load %arg4[%c4_124, %c0_125, %c0_126] : memref<5x128x256xf32, #tpu.memory_space<vmem>>, vector<1x128x256xf32>
    %119 = vector.shape_cast %118 : vector<1x128x256xf32> to vector<128x256xf32>
    %cst_127 = arith.constant dense<0.000000e+00> : vector<4x256xf32>
    %120 = tpu.matmul %117, %119, %cst_127 {dimension_numbers = #tpu.dot_dimension_numbers<[1], [0], [0], [1], [0, 0, 1, 1], [], []>} : vector<4x128xf32>, vector<128x256xf32>, vector<4x256xf32> -> vector<4x256xf32>
    %121 = arith.addf %116, %120 : vector<4x256xf32>
    %122 = vector.extract_strided_slice %121 {offsets = [0, 0], sizes = [4, 128], strides = [1, 1]} : vector<4x256xf32> to vector<4x128xf32>
    %123 = vector.extract_strided_slice %121 {offsets = [0, 128], sizes = [4, 128], strides = [1, 1]} : vector<4x256xf32> to vector<4x128xf32>
    %124 = arith.maximumf %122, %123 : vector<4x128xf32>
    %125 = arith.maximumf %97, %124 : vector<4x128xf32>
    %c0_128 = arith.constant 0 : index
    %c0_129 = arith.constant 0 : index
    %126 = vector.load %arg5[%c0_128, %c0_129] : memref<1x128xf32, #tpu.memory_space<vmem>>, vector<1x128xf32>
    %127 = vector.broadcast %126 : vector<1x128xf32> to vector<4x128xf32>
    %128 = arith.addf %125, %127 : vector<4x128xf32>
    %cst_130 = arith.constant 0.000000e+00 : f32
    %129 = vector.broadcast %cst_130 : f32 to vector<4x128xf32>
    %130 = arith.maximumf %128, %129 : vector<4x128xf32>
    %c0_131 = arith.constant 0 : index
    %c0_132 = arith.constant 0 : index
    %131 = vector.load %arg7[%c0_131, %c0_132] : memref<1x10xf32, #tpu.memory_space<vmem>>, vector<1x10xf32>
    %132 = vector.extract_strided_slice %130 {offsets = [0, 0], sizes = [1, 128], strides = [1, 1]} : vector<4x128xf32> to vector<1x128xf32>
    %c0_133 = arith.constant 0 : index
    %c0_134 = arith.constant 0 : index
    %c0_135 = arith.constant 0 : index
    %133 = vector.load %arg6[%c0_133, %c0_134, %c0_135] : memref<4x128x10xf32, #tpu.memory_space<vmem>>, vector<1x128x10xf32>
    %134 = vector.shape_cast %133 : vector<1x128x10xf32> to vector<128x10xf32>
    %cst_136 = arith.constant dense<0.000000e+00> : vector<1x10xf32>
    %135 = tpu.matmul %132, %134, %cst_136 {dimension_numbers = #tpu.dot_dimension_numbers<[1], [0], [0], [1], [0, 0, 1, 1], [], []>} : vector<1x128xf32>, vector<128x10xf32>, vector<1x10xf32> -> vector<1x10xf32>
    %136 = arith.addf %131, %135 : vector<1x10xf32>
    %137 = vector.extract_strided_slice %130 {offsets = [1, 0], sizes = [1, 128], strides = [1, 1]} : vector<4x128xf32> to vector<1x128xf32>
    %c1_137 = arith.constant 1 : index
    %c0_138 = arith.constant 0 : index
    %c0_139 = arith.constant 0 : index
    %138 = vector.load %arg6[%c1_137, %c0_138, %c0_139] : memref<4x128x10xf32, #tpu.memory_space<vmem>>, vector<1x128x10xf32>
    %139 = vector.shape_cast %138 : vector<1x128x10xf32> to vector<128x10xf32>
    %cst_140 = arith.constant dense<0.000000e+00> : vector<1x10xf32>
    %140 = tpu.matmul %137, %139, %cst_140 {dimension_numbers = #tpu.dot_dimension_numbers<[1], [0], [0], [1], [0, 0, 1, 1], [], []>} : vector<1x128xf32>, vector<128x10xf32>, vector<1x10xf32> -> vector<1x10xf32>
    %141 = arith.addf %136, %140 : vector<1x10xf32>
    %142 = vector.extract_strided_slice %130 {offsets = [2, 0], sizes = [1, 128], strides = [1, 1]} : vector<4x128xf32> to vector<1x128xf32>
    %c2_141 = arith.constant 2 : index
    %c0_142 = arith.constant 0 : index
    %c0_143 = arith.constant 0 : index
    %143 = vector.load %arg6[%c2_141, %c0_142, %c0_143] : memref<4x128x10xf32, #tpu.memory_space<vmem>>, vector<1x128x10xf32>
    %144 = vector.shape_cast %143 : vector<1x128x10xf32> to vector<128x10xf32>
    %cst_144 = arith.constant dense<0.000000e+00> : vector<1x10xf32>
    %145 = tpu.matmul %142, %144, %cst_144 {dimension_numbers = #tpu.dot_dimension_numbers<[1], [0], [0], [1], [0, 0, 1, 1], [], []>} : vector<1x128xf32>, vector<128x10xf32>, vector<1x10xf32> -> vector<1x10xf32>
    %146 = arith.addf %141, %145 : vector<1x10xf32>
    %147 = vector.extract_strided_slice %130 {offsets = [3, 0], sizes = [1, 128], strides = [1, 1]} : vector<4x128xf32> to vector<1x128xf32>
    %c3_145 = arith.constant 3 : index
    %c0_146 = arith.constant 0 : index
    %c0_147 = arith.constant 0 : index
    %148 = vector.load %arg6[%c3_145, %c0_146, %c0_147] : memref<4x128x10xf32, #tpu.memory_space<vmem>>, vector<1x128x10xf32>
    %149 = vector.shape_cast %148 : vector<1x128x10xf32> to vector<128x10xf32>
    %cst_148 = arith.constant dense<0.000000e+00> : vector<1x10xf32>
    %150 = tpu.matmul %147, %149, %cst_148 {dimension_numbers = #tpu.dot_dimension_numbers<[1], [0], [0], [1], [0, 0, 1, 1], [], []>} : vector<1x128xf32>, vector<128x10xf32>, vector<1x10xf32> -> vector<1x10xf32>
    %151 = arith.addf %146, %150 : vector<1x10xf32>
    %c0_149 = arith.constant 0 : index
    %c0_150 = arith.constant 0 : index
    %c0_151 = arith.constant 0 : index
    %152 = vector.load %arg8[%c0_149, %c0_150, %c0_151] : memref<1x1x10xf32, #tpu.memory_space<vmem>>, vector<1x1x10xf32>
    %153 = vector.shape_cast %152 : vector<1x1x10xf32> to vector<1x10xf32>
    %154 = vector.shape_cast %151 : vector<1x10xf32> to vector<1x1x10xf32>
    tpu.vector_store %arg8[%c0_149, %c0_150, %c0_151], %154 {strides = array<i32>} : memref<1x1x10xf32, #tpu.memory_space<vmem>>, vector<1x1x10xf32>,
    return
  }
  func.func @transform_0(%arg0: i32) -> (i32, i32, i32) {
    %c0_i32 = arith.constant 0 : i32
    %c0_i32_0 = arith.constant 0 : i32
    %c0_i32_1 = arith.constant 0 : i32
    return %arg0, %c0_i32, %c0_i32_0 : i32, i32, i32
  }
  func.func @transform_1(%arg0: i32) -> (i32, i32, i32) {
    %c0_i32 = arith.constant 0 : i32
    %c0_i32_0 = arith.constant 0 : i32
    %c0_i32_1 = arith.constant 0 : i32
    %c0_i32_2 = arith.constant 0 : i32
    return %c0_i32, %c0_i32_0, %c0_i32_1 : i32, i32, i32
  }
  func.func @transform_2(%arg0: i32) -> (i32, i32) {
    %c0_i32 = arith.constant 0 : i32
    %c0_i32_0 = arith.constant 0 : i32
    %c0_i32_1 = arith.constant 0 : i32
    return %c0_i32, %c0_i32_0 : i32, i32
  }
  func.func @transform_3(%arg0: i32) -> (i32, i32, i32) {
    %c0_i32 = arith.constant 0 : i32
    %c0_i32_0 = arith.constant 0 : i32
    %c0_i32_1 = arith.constant 0 : i32
    %c0_i32_2 = arith.constant 0 : i32
    return %c0_i32, %c0_i32_0, %c0_i32_1 : i32, i32, i32
  }
  func.func @transform_4(%arg0: i32) -> (i32, i32) {
    %c0_i32 = arith.constant 0 : i32
    %c0_i32_0 = arith.constant 0 : i32
    %c0_i32_1 = arith.constant 0 : i32
    return %c0_i32, %c0_i32_0 : i32, i32
  }
  func.func @transform_5(%arg0: i32) -> (i32, i32, i32) {
    %c0_i32 = arith.constant 0 : i32
    %c0_i32_0 = arith.constant 0 : i32
    %c0_i32_1 = arith.constant 0 : i32
    %c0_i32_2 = arith.constant 0 : i32
    return %c0_i32, %c0_i32_0, %c0_i32_1 : i32, i32, i32
  }
  func.func @transform_6(%arg0: i32) -> (i32, i32) {
    %c0_i32 = arith.constant 0 : i32
    %c0_i32_0 = arith.constant 0 : i32
    %c0_i32_1 = arith.constant 0 : i32
    return %c0_i32, %c0_i32_0 : i32, i32
  }
  func.func @transform_7(%arg0: i32) -> (i32, i32, i32) {
    %c0_i32 = arith.constant 0 : i32
    %c0_i32_0 = arith.constant 0 : i32
    %c0_i32_1 = arith.constant 0 : i32
    return %arg0, %c0_i32, %c0_i32_0 : i32, i32, i32
  }
}

</mosaic_0001>

<bundles_post_ra>
// kernel: net_forward.1
= control target key start
LH: loop header
LB: loop body
LE: loop exit
PB: predicated region body
PF: predicated region fallthrough
CT: control target
= control target key end

     0   :  { %12 = vsyncpa [#allocation4], 0  ;;  %s4667_s0 = inlined_call_operand.vmem [shape: f32[2,28,28], index: 0, kind: input, shape index: {}]   ;;  %s4668_s1 = inlined_call_operand.vmem [shape: f32[5,28,256], index: 1, kind: input, shape index: {}]   ;;  %s4669_s2 = inlined_call_operand.vmem [shape: f32[1,128], index: 2, kind: input, shape index: {}]   ;;  %s4670_s3 = inlined_call_operand.hbm [shape: f32[5,128,256], index: 3, kind: input, shape index: {}]   ;;  %s4671_s4 = inlined_call_operand.vmem [shape: f32[1,128], index: 4, kind: input, shape index: {}]   ;;  %s4672_s5 = inlined_call_operand.vmem [shape: f32[4,128,10], index: 5, kind: input, shape index: {}]   ;;  %s4673_s6 = inlined_call_operand.vmem [shape: f32[1,10], index: 6, kind: input, shape index: {}]   ;;  %s4674_s7 = inlined_call_operand.hbm [shape: f32[2,1,10], index: 7, kind: output, shape index: {}]  }
   0x1   :  { %13 = vsyncpa [#allocation5], 0 }
   0x2   :  { %15 = vsyncpa [#allocation5 + $0x1], 0  ;;  %s3713_s24 = smov 0   ;;  %s3715_s25 = smov 0  }
   0x3   :  { %s3717_s26 = smov 0   ;;  %s3719_s27 = smov 0  }
   0x4 LB: > { %s3734_s28 = sadd.s32 4294967295, %s3663_s27   ;;  %s2589_s29 = sadd.s32 4294967294, %s3663_s27   ;;  %s3663_s27 = sphi %s3719_s27, %s4740_s27   ;;  %s3659_s26 = sphi %s3717_s26, %s4739_s26   ;;  %s3655_s25 = sphi %s3715_s25, %s4738_s25   ;;  %s3651_s24 = sphi %s3713_s24, %s4737_s24  }
   0x5   : > { %s3738_s30 = sadd.s32 1, %s3663_s27   ;;  %s180_s8 = sadd.s32 1, %s3659_s26 }
   0x6   : > { %s177_s9 = ssub.s32 %s3663_s27, %s3738_s30  ;;  %p190_p0 = scmp.ne.s32.totalorder %s3659_s26, %s3655_s25 }
   0x7   : > { %p178_p1 = scmp.eq.s32.totalorder %s177_s9, 0  ;;  %p191_p2 = scmp.eq.s32.totalorder %s3734_s28, 1 }
   0x8   : > { %p196_p3 = scmp.ne.s32.totalorder %s3655_s25, %s3651_s24  ;;  %p197_p4 = scmp.eq.s32.totalorder %s2589_s29, 1 }
   0x9   : > { %s3749_s10 = scalar_select %p178_p1, %s3659_s26, %s180_s8  }
   0xa   : > { %p3751_p5 = por %p191_p2, %p190_p0  ;;  %p3755_p6 = por %p197_p4, %p196_p3 }
   0xb   : > { %p2590_p7 = scmp.ge.s32.totalorder %s3663_s27, 1  ;;  %p204_p8 = scmp.lt.s32.totalorder %s3663_s27, 3 }
   0xc   : > { %s4695_s11 = scalar_select %p3751_p5, 1, 0 }
   0xd   : > { %s4696_s12 = scalar_select %p3755_p6, 1, 0 }
   0xe   : > { %p4675_p9 = scmp.eq.s32.totalorder %s3734_s28, 0  ;;  %p3762_p10 = pnand %p2590_p7, %p204_p8 }
   0xf   : > { %s3665_s14 = smov [#allocation3]   ;;  %s3569_s19 = scalar_lea.hbm %s4670_s3, 20480 }
  0x10   : > { %s4697_s13 = scalar_select %p3762_p10, 1, 0 }
  0x11   : > { %s222_s15 = sshll.u32 %s3665_s14, 4  ;;  %p3519_p11 = pneg %p3762_p10  ;;  %s223_s15 = int_to_ptr.vmem [resolvable:$true] %s222_s15 }
  0x12   : > { %p3570_p13 = scmp.ne.s32.totalorder %s4670_s3, %s3569_s19  ;;  %p3576_p3 = scmp.lt.u32.totalorder %s3569_s19, %s4670_s3 }
  0x13   : > { %p3770_p12 = pnand %p4675_p9, %p3519_p11 }
  0x15   : > { %p3571_p0 = pneg %p3770_p12 }
  0x17   : > { %p3572_p1 = pnand %p3571_p0, %p3570_p13 }
  0x19   : > { %p3573_p2 = pneg %p3572_p1 }
  0x1b   : > { %p3578_p4 = pnand %p3576_p3, %p3573_p2 }
  0x1d   : > { %3581 = shalt.err (!%p3578_p4)
}
  0x1e   : > { %s3582_s29 = scalar_lea.vmem %s223_s15, 20480  ;;  %p3590_p9 = scmp.lt.s32.totalorder %s223_s15, %s223_s15 }
  0x1f   : > { %p3583_p7 = scmp.ne.s32.totalorder %s223_s15, %s3582_s29  ;;  %p3591_p6 = scmp.lt.s32.totalorder %s3582_s29, %s3582_s29 }
  0x21   : > { %p3585_p8 = pnand %p3583_p7, %p3571_p0  ;;  %p3592_p5 = por %p3591_p6, %p3590_p9 }
  0x23   : > { %p3586_p11 = pneg %p3585_p8 }
  0x25   : > { %p3593_p10 = pnand %p3592_p5, %p3586_p11 }
  0x27   : > { %3596 = shalt.err (!%p3593_p10)
}
  0x28   : > { %s3666_s8 = smov 256   ;;  %s3667_s9 = smov 16  }
  0x29   : > { %3522 = dma.hbm_to_vmem [thread:$0]  (!%p3770_p12), %s4670_s3, 20480, %s223_s15, [#allocation4], %s3666_s8, %s3666_s8, %s3667_s9  }
  0x2a   : > { %p4699_p13 = scmp.ne.s32.totalorder %s4697_s13, 0 }
  0x2c   : > { %255 = sbr.rel (%p4699_p13) target bundleno = 1063 (0x427), region = 48 }
  0x33   : > { %p4700_p1 = scmp.eq.s32.totalorder %s3734_s28, 0 }
  0x35   : > { %3642 = dma.done.wait (%p4700_p1), [#allocation4], 20480   ;;  %p4701_p0 = pmov %p4700_p1 }
  0x36   : > { %v4678_v0 = vmov 0.0   ;;  %p286_p5 = scmp.lt.s32.totalorder %s3734_s28, 1  ;;  %vm322_vm0 = vcmask 1043456   ;;  %v2601_v1 = vld [vmem:[%s4668_s1 + $0x48] sm:$0xff]  ;;  %v2603_v2 = vld [vmem:[%s4668_s1 + $0x58] sm:$0xff]  ;;  %v2600_v3 = vld [vmem:[%s4668_s1 + $0x40] sm:$0xff] }
  0x37   : > { %3644 = vsyncadd (%p4701_p0), [#allocation4], 4294946816  ;;  %393 = vmatprep.mubr.f32.mxu0 %v4678_v0  ;;  %879 = vmatprep.mubr.f32.mxu1 %v4678_v0  ;;  %v2942_v4 = vpack.c.bf16 %v2603_v2, %v2601_v1  ;;  %v2602_v5 = vld [vmem:[%s4668_s1 + $0x50] sm:$0xff]  ;;  %v2605_v6 = vld [vmem:[%s4668_s1 + $0x68] sm:$0xff]  ;;  %vm3669_vm1 = vmmov 1   ;;  %vm315_vm3 = vcmask 228352  }
  0x38   : > { %s287_s16 = scalar_select %p286_p5, %s3734_s28, 1  ;;  %v2607_v7 = vld [vmem:[%s4668_s1 + $0x78] sm:$0xf]  ;;  %v2944_v8 = vpack.c.bf16 %v2602_v5, %v2600_v3  ;;  %vm3818_vm2 = vmpackc.low %vm322_vm0, %vm3669_vm1  ;;  %v2604_v11 = vld [vmem:[%s4668_s1 + $0x60] sm:$0xff]  ;;  %vm3671_vm4 = vmmov 0   ;;  %vm2507_vm5 = vcmask 73728  }
  0x39   : > { %v2946_v9 = vpack.c.bf16 %v2607_v7, %v2605_v6  ;;  %v2606_v12 = vld [vmem:[%s4668_s1 + $0x70] sm:$0xf]  ;;  %2943 = vmatprep.subr.bf16.mxu0 %v2942_v4  ;;  %2993 = vmatprep.subr.bf16.mxu1 %v2942_v4  ;;  %v295_v13 = vld [vmem:[%s4668_s1 + $0x8] sm:$0xff]  ;;  %v297_v14 = vld [vmem:[%s4668_s1 + $0x18] sm:$0xff]  ;;  %s284_s9 = sand.u32 1, %s3655_s25   ;;  %s2730_s15 = sshll.u32 %s3734_s28, 4 }
  0x3a   : > { %s2733_s19 = sshll.u32 %s287_s16, 5  ;;  %2945 = vmatpush1.bf16.msra.mxu0 %v2944_v8  ;;  %2995 = vmatpush1.bf16.msra.mxu1 %v2944_v8  ;;  %v2949_v15 = vpack.c.bf16 %v2606_v12, %v2604_v11  ;;  %v2952_v16 = vpack.c.bf16 %v297_v14, %v295_v13  ;;  %v294_v17 = vld [vmem:[%s4668_s1] sm:$0xff]  ;;  %v296_v18 = vld [vmem:[%s4668_s1 + $0x10] sm:$0xff]  ;;  %v299_v19 = vld [vmem:[%s4668_s1 + $0x28] sm:$0xff]  ;;  %s285_s18 = scalar_lea.vmem [#allocation6], %s284_s9 }
  0x3b   : > { %2948 = vmatprep.subr.msk.bf16.mxu0 %vm3818_vm2, %v2946_v9  ;;  %2998 = vmatprep.subr.msk.bf16.mxu1 %vm3818_vm2, %v2946_v9  ;;  %s3841_s8 = scalar_lea.vmem %s4667_s0, %s2733_s19  ;;  %v301_v20 = vld [vmem:[%s4668_s1 + $0x38] sm:$0xf]  ;;  %v2954_v23 = vpack.c.bf16 %v296_v18, %v294_v17  ;;  %v298_v24 = vld [vmem:[%s4668_s1 + $0x20] sm:$0xff]  ;;  %v300_v25 = vld [vmem:[%s4668_s1 + $0x30] sm:$0xf]  ;;  %s2522_s13 = sshll.u32 %s285_s18, 4  ;;  %s4627_s13 = int_to_ptr.vmem [resolvable:$true] %s2522_s13 }
  0x3c   : > { %v2598_v21 = vld [vmem:[%s3841_s8 + $0x1] ss:$2 sm:$0xff]  ;;  %v3861_v22 = vld [vmem:[%s3841_s8 + $0x2] ss:$2 sm:$0xff]  ;;  %v2956_v26 = vpack.c.bf16 %v301_v20, %v299_v19  ;;  %v2621_v28 = vld [vmem:[%s4668_s1 + $0x98] sm:$0xff]  ;;  %v2959_v31 = vpack.c.bf16 %v300_v25, %v298_v24  ;;  %s2510_s19 = scalar_lea.sflag [#allocation5], %s284_s9 }
  0x3d   : > { %v2619_v27 = vld [vmem:[%s4668_s1 + $0x88] sm:$0xff]  ;;  %v2599_v29 = vld [vmem:[%s3841_s8 + $0x11] ss:$2 sm:$0xf]  ;;  %v2618_v32 = vld [vmem:[%s4668_s1 + $0x80] sm:$0xff]  ;;  %s3597_s22 = scalar_lea.vmem %s4627_s13, 16 }
  0x3e   : > { %2951 = vmatpush1.bf16.msk.msra.mxu0 %vm3818_vm2, %v2949_v15  ;;  %3001 = vmatpush1.bf16.msk.msra.mxu1 %vm3818_vm2, %v2949_v15  ;;  %v3880_v30 = vld [vmem:[%s3841_s8 + $0x12] ss:$2 sm:$0xf]  ;;  %v2962_v34 = vpack.c.bf16 %v2621_v28, %v2619_v27  ;;  %v2623_v35 = vld [vmem:[%s4668_s1 + $0xa8] sm:$0xff]  ;;  %v2622_v39 = vld [vmem:[%s4668_s1 + $0xa0] sm:$0xff]  ;;  %p3598_p6 = scmp.ne.s32.totalorder %s4627_s13, %s3597_s22  ;;  %p4735_p9 = scmp.ne.s32.totalorder %s4695_s11, 0 }
  0x3f   : > { %2953 = vmatprep.subr.bf16.mxu0 %v2952_v16  ;;  %3003 = vmatprep.subr.bf16.mxu1 %v2952_v16  ;;  %v2620_v33 = vld [vmem:[%s4668_s1 + $0x90] sm:$0xff]  ;;  %v2625_v36 = vld [vmem:[%s4668_s1 + $0xb8] sm:$0xf]  ;;  %v291_v37 = vld [vmem:[%s3841_s8] ss:$2 sm:$0xff]  ;;  %s3672_s28 = smov [#allocation6]  }
  0x40   : > { %v2964_v38 = vpack.c.bf16 %v2620_v33, %v2618_v32  ;;  %v2624_v40 = vld [vmem:[%s4668_s1 + $0xb0] sm:$0xf]  ;;  %v2966_v41 = vpack.c.bf16 %v2625_v36, %v2623_v35  ;;  %v2633_v42 = vld [vmem:[%s4668_s1 + $0xc8] sm:$0xff]  ;;  %v2635_v43 = vld [vmem:[%s4668_s1 + $0xd8] sm:$0xff]  ;;  %p3599_p10 = pnand %p3598_p6, %p4735_p9  ;;  %s3601_s23 = sshll.u32 %s3672_s28, 4  ;;  %s3602_s23 = int_to_ptr.vmem [resolvable:$false] %s3601_s23 }
  0x41   : > { %2610 = vmatmul.mubr.msk.f32.vlgmr.msra.gmra.mrb[0].mxu0 %vm315_vm3, %v2598_v21  ;;  %2660 = vmatmul.mubr.msk.f32.vlgmr.msra.gmra.mrb[0].mxu1 %vm315_vm3, %v3861_v22  ;;  %v2597_v44 = vld [vmem:[%s3841_s8 + $0x10] ss:$2 sm:$0xf]  ;;  %v2969_v45 = vpack.c.bf16 %v2624_v40, %v2622_v39  ;;  %v2632_v46 = vld [vmem:[%s4668_s1 + $0xc0] sm:$0xff]  ;;  %v2972_v48 = vpack.c.bf16 %v2635_v43, %v2633_v42  ;;  %v2637_v49 = vld [vmem:[%s4668_s1 + $0xe8] sm:$0xff]  ;;  %s3603_s16 = scalar_lea.vmem %s3602_s23, 32  ;;  %p3604_p2 = scmp.lt.s32.totalorder %s4627_s13, %s3602_s23 }
  0x42   : > { %2955 = vmatpush1.bf16.msra.mxu0 %v2954_v23  ;;  %3005 = vmatpush1.bf16.msra.mxu1 %v2954_v23  ;;  %v2634_v47 = vld [vmem:[%s4668_s1 + $0xd0] sm:$0xff]  ;;  %v2639_v50 = vld [vmem:[%s4668_s1 + $0xf8] sm:$0xf]  ;;  %v2636_v53 = vld [vmem:[%s4668_s1 + $0xe0] sm:$0xff]  ;;  %p3600_p12 = pneg %p3599_p10  ;;  %p3605_p3 = scmp.lt.s32.totalorder %s3603_s16, %s3597_s22 }
  0x43   : > { %399 = vmatprep.mubr.f32.mxu0 %v4678_v0  ;;  %885 = vmatprep.mubr.f32.mxu1 %v4678_v0  ;;  %v2630_v51 = vld [vmem:[%s3841_s8 + $0x3] ss:$2 sm:$0xff]  ;;  %v2974_v52 = vpack.c.bf16 %v2634_v47, %v2632_v46  ;;  %v2976_v55 = vpack.c.bf16 %v2639_v50, %v2637_v49  ;;  %v2649_v57 = vld [vmem:[%s4668_s1 + $0x118] sm:$0xff]  ;;  %v2644_v2 = vld [vmem:[%s3841_s8 + $0x4] ss:$2 sm:$0xff] }
  0x44   : > { %2958 = vmatprep.subr.msk.bf16.mxu0 %vm3818_vm2, %v2956_v26  ;;  %3008 = vmatprep.subr.msk.bf16.mxu1 %vm3818_vm2, %v2956_v26  ;;  %v2638_v54 = vld [vmem:[%s4668_s1 + $0xf0] sm:$0xf]  ;;  %v2647_v56 = vld [vmem:[%s4668_s1 + $0x108] sm:$0xff]  ;;  %v2646_v60 = vld [vmem:[%s4668_s1 + $0x100] sm:$0xff]  ;;  %p3606_p4 = por %p3605_p3, %p3604_p2 }
  0x45   : > { %2611 = vmatmul.mubr.msk.f32.gmra.mrb[2].mxu0 %vm315_vm3, %v2599_v29  ;;  %2661 = vmatmul.mubr.msk.f32.gmra.mrb[2].mxu1 %vm315_vm3, %v3880_v30  ;;  %v2631_v58 = vld [vmem:[%s3841_s8 + $0x13] ss:$2 sm:$0xf]  ;;  %v2979_v59 = vpack.c.bf16 %v2638_v54, %v2636_v53  ;;  %v2982_v62 = vpack.c.bf16 %v2649_v57, %v2647_v56  ;;  %v2651_v63 = vld [vmem:[%s4668_s1 + $0x128] sm:$0xff]  ;;  %v2650_v4 = vld [vmem:[%s4668_s1 + $0x120] sm:$0xff] }
  0x46   : > { %2961 = vmatpush1.bf16.msk.msra.mxu0 %vm3818_vm2, %v2959_v31  ;;  %3011 = vmatpush1.bf16.msk.msra.mxu1 %vm3818_vm2, %v2959_v31  ;;  %v2648_v61 = vld [vmem:[%s4668_s1 + $0x110] sm:$0xff]  ;;  %v2653_v1 = vld [vmem:[%s4668_s1 + $0x138] sm:$0xf]  ;;  %v1278_v8 = vld [vmem:[#allocation3 + $0x118] sm:$0xff]  ;;  %p3607_p7 = pnand %p3606_p4, %p3600_p12 }
  0x47   : > { %482 = vmatprep.mubr.f32.mxu0 %v4678_v0  ;;  %956 = vmatprep.mubr.f32.mxu1 %v4678_v0  ;;  %v2984_v3 = vpack.c.bf16 %v2648_v61, %v2646_v60  ;;  %v2652_v5 = vld [vmem:[%s4668_s1 + $0x130] sm:$0xf]  ;;  %v2986_v6 = vpack.c.bf16 %v2653_v1, %v2651_v63  ;;  %v1276_v7 = vld [vmem:[#allocation3 + $0x108] sm:$0xff]  ;;  %v1455_v11 = vld [vmem:[#allocation3 + $0x218] sm:$0xff] }
  0x48   : > { %2963 = vmatprep.subr.bf16.mxu0 %v2962_v34  ;;  %3013 = vmatprep.subr.bf16.mxu1 %v2962_v34  ;;  %v1453_v9 = vld [vmem:[#allocation3 + $0x208] sm:$0xff]  ;;  %v2989_v13 = vpack.c.bf16 %v2652_v5, %v2650_v4  ;;  %v1275_v14 = vld [vmem:[#allocation3 + $0x100] sm:$0xff]  ;;  %v1277_v15 = vld [vmem:[#allocation3 + $0x110] sm:$0xff]  ;;  %v4011_v16 = vpack.c.bf16 %v1278_v8, %v1276_v7 }
  0x49   : > { %2614 = vmatmul.mubr.msk.f32.vlgmr.msra.gmra.mrb[0].mxu0 %vm315_vm3, %v291_v37  ;;  %2664 = vmatmul.mubr.msk.f32.vlgmr.msra.gmra.mrb[0].mxu1 %vm315_vm3, %v2598_v21  ;;  %v2645_v12 = vld [vmem:[%s3841_s8 + $0x14] ss:$2 sm:$0xf]  ;;  %v4013_v18 = vpack.c.bf16 %v1455_v11, %v1453_v9  ;;  %v1454_v20 = vld [vmem:[#allocation3 + $0x210] sm:$0xff]  ;;  %v1282_v21 = vld [vmem:[#allocation3 + $0x138] sm:$0xff]  ;;  %v4024_v25 = vpack.c.bf16 %v1277_v15, %v1275_v14 }
  0x4a   : > { %2965 = vmatpush1.bf16.msra.mxu0 %v2964_v38  ;;  %3015 = vmatpush1.bf16.msra.mxu1 %v2964_v38  ;;  %v1280_v17 = vld [vmem:[#allocation3 + $0x128] sm:$0xff]  ;;  %v1452_v19 = vld [vmem:[#allocation3 + $0x200] sm:$0xff]  ;;  %v1459_v23 = vld [vmem:[#allocation3 + $0x238] sm:$0xff] }
  0x4b   : > { %488 = vmatprep.mubr.f32.mxu0 %v4678_v0  ;;  %962 = vmatprep.mubr.f32.mxu1 %v4678_v0  ;;  %v2674_v24 = vld [vmem:[%s3841_s8 + $0x5] ss:$2 sm:$0xff]  ;;  %v4026_v28 = vpack.c.bf16 %v1454_v20, %v1452_v19  ;;  %v1284_v10 = vld [vmem:[#allocation3 + $0x148] sm:$0xff] }
  0x4c   : > { %2968 = vmatprep.subr.msk.bf16.mxu0 %vm3818_vm2, %v2966_v41  ;;  %3018 = vmatprep.subr.msk.bf16.mxu1 %vm3818_vm2, %v2966_v41  ;;  %v1279_v26 = vld [vmem:[#allocation3 + $0x120] sm:$0xff]  ;;  %v1281_v27 = vld [vmem:[#allocation3 + $0x130] sm:$0xff]  ;;  %v1286_v33 = vld [vmem:[#allocation3 + $0x158] sm:$0xff] }
  0x4d   : > { %2615 = vmatmul.mubr.msk.f32.gmra.mrb[2].mxu0 %vm315_vm3, %v2597_v44  ;;  %2665 = vmatmul.mubr.msk.f32.gmra.mrb[2].mxu1 %vm315_vm3, %v2599_v29  ;;  %v4029_v29 = vpack.c.bf16 %v1282_v21, %v1280_v17  ;;  %v1456_v31 = vld [vmem:[#allocation3 + $0x220] sm:$0xff]  ;;  %v1458_v32 = vld [vmem:[#allocation3 + $0x230] sm:$0xff]  ;;  %v1461_v34 = vld [vmem:[#allocation3 + $0x248] sm:$0xff]  ;;  %v4040_v37 = vpack.c.bf16 %v1281_v27, %v1279_v26  ;;  %v4046_v40 = vpack.c.bf16 %v1286_v33, %v1284_v10 }
  0x4e   : > { %2971 = vmatpush1.bf16.msk.msra.mxu0 %vm3818_vm2, %v2969_v45  ;;  %3021 = vmatpush1.bf16.msk.msra.mxu1 %vm3818_vm2, %v2969_v45  ;;  %v1463_v35 = vld [vmem:[#allocation3 + $0x258] sm:$0xff]  ;;  %v2675_v36 = vld [vmem:[%s3841_s8 + $0x15] ss:$2 sm:$0xf]  ;;  %v4043_v39 = vpack.c.bf16 %v1458_v32, %v1456_v31  ;;  %v1285_v41 = vld [vmem:[#allocation3 + $0x150] sm:$0xff]  ;;  %s4625_s8 = scalar_lea.hbm %s4674_s7, %s2730_s15 }
  0x4f   : > { %584 = vmatprep.mubr.f32.mxu0 %v4678_v0  ;;  %1033 = vmatprep.mubr.f32.mxu1 %v4678_v0  ;;  %v1283_v38 = vld [vmem:[#allocation3 + $0x140] sm:$0xff]  ;;  %v4049_v42 = vpack.c.bf16 %v1463_v35, %v1461_v34  ;;  %v1462_v44 = vld [vmem:[#allocation3 + $0x250] sm:$0xff]  ;;  %v1288_v45 = vld [vmem:[#allocation3 + $0x168] sm:$0xff] }
  0x50   : > { %2973 = vmatprep.subr.bf16.mxu0 %v2972_v48  ;;  %3023 = vmatprep.subr.bf16.mxu1 %v2972_v48  ;;  %v1460_v43 = vld [vmem:[#allocation3 + $0x240] sm:$0xff]  ;;  %v1290_v46 = vld [vmem:[#allocation3 + $0x178] sm:$0xff]  ;;  %v4056_v47 = vpack.c.bf16 %v1285_v41, %v1283_v38  ;;  %v1292_v53 = vld [vmem:[#allocation3 + $0x188] sm:$0xff] }
  0x51   : > { %2628 = vmatmul.mubr.msk.f32.vlgmr.msra.gmra.mrb[0].mxu0 %vm315_vm3, %v3861_v22  ;;  %2668 = vmatmul.mubr.msk.f32.vlgmr.msra.gmra.mrb[0].mxu1 %vm315_vm3, %v2630_v51  ;;  %v1457_v22 = vld [vmem:[#allocation3 + $0x228] sm:$0xff]  ;;  %v4059_v48 = vpack.c.bf16 %v1462_v44, %v1460_v43  ;;  %v4062_v49 = vpack.c.bf16 %v1290_v46, %v1288_v45  ;;  %v1287_v50 = vld [vmem:[#allocation3 + $0x160] sm:$0xff]  ;;  %v1294_v54 = vld [vmem:[#allocation3 + $0x198] sm:$0xff] }
  0x52   : > { %2975 = vmatpush1.bf16.msra.mxu0 %v2974_v52  ;;  %3025 = vmatpush1.bf16.msra.mxu1 %v2974_v52  ;;  %v4071_v56 = vpack.c.bf16 %v1294_v54, %v1292_v53  ;;  %v1467_v57 = vld [vmem:[#allocation3 + $0x278] sm:$0xff]  ;;  %v1466_v63 = vld [vmem:[#allocation3 + $0x270] sm:$0xff]  ;;  %v1469_v4 = vld [vmem:[#allocation3 + $0x288] sm:$0xff] }
  0x53   : > { %590 = vmatprep.mubr.f32.mxu0 %v4678_v0  ;;  %1039 = vmatprep.mubr.f32.mxu1 %v4678_v0  ;;  %v1295_v7 = vld [vmem:[#allocation3 + $0x1a0] sm:$0xff]  ;;  %v1297_v8 = vld [vmem:[#allocation3 + $0x1b0] sm:$0xff]  ;;  %v1300_v15 = vld [vmem:[#allocation3 + $0x1c8] sm:$0xff] }
  0x54   : > { %2978 = vmatprep.subr.msk.bf16.mxu0 %vm3818_vm2, %v2976_v55  ;;  %3028 = vmatprep.subr.msk.bf16.mxu1 %vm3818_vm2, %v2976_v55  ;;  %v1465_v55 = vld [vmem:[#allocation3 + $0x268] sm:$0xff]  ;;  %v4087_v11 = vpack.c.bf16 %v1297_v8, %v1295_v7  ;;  %v1302_v17 = vld [vmem:[#allocation3 + $0x1d8] sm:$0xff]  ;;  %v1472_v27 = vld [vmem:[#allocation3 + $0x2a0] sm:$0xff] }
  0x55   : > { %2629 = vmatmul.mubr.msk.f32.gmra.mrb[2].mxu0 %vm315_vm3, %v3880_v30  ;;  %2669 = vmatmul.mubr.msk.f32.gmra.mrb[2].mxu1 %vm315_vm3, %v2631_v58  ;;  %v4032_v30 = vpack.c.bf16 %v1459_v23, %v1457_v22  ;;  %v4073_v60 = vpack.c.bf16 %v1467_v57, %v1465_v55  ;;  %v1473_v19 = vld [vmem:[#allocation3 + $0x2a8] sm:$0xff]  ;;  %v4095_v20 = vpack.c.bf16 %v1302_v17, %v1300_v15  ;;  %v1475_v21 = vld [vmem:[#allocation3 + $0x2b8] sm:$0xff]  ;;  %v1299_v22 = vld [vmem:[#allocation3 + $0x1c0] sm:$0xff] }
  0x56   : > { %2981 = vmatpush1.bf16.msk.msra.mxu0 %vm3818_vm2, %v2979_v59  ;;  %3031 = vmatpush1.bf16.msk.msra.mxu1 %vm3818_vm2, %v2979_v59  ;;  %v1293_v59 = vld [vmem:[#allocation3 + $0x190] sm:$0xff]  ;;  %v1304_v32 = vld [vmem:[#allocation3 + $0x1e8] sm:$0xff]  ;;  %v1306_v33 = vld [vmem:[#allocation3 + $0x1f8] sm:$0xff] }
  0x57   : > { %690 = vmatprep.mubr.f32.mxu0 %v4678_v0  ;;  %1114 = vmatprep.mubr.f32.mxu1 %v4678_v0  ;;  %v1301_v23 = vld [vmem:[#allocation3 + $0x1d0] sm:$0xff]  ;;  %v1477_v34 = vld [vmem:[#allocation3 + $0x2c8] sm:$0xff]  ;;  %v4107_v35 = vpack.c.bf16 %v1306_v33, %v1304_v32  ;;  %v1303_v38 = vld [vmem:[#allocation3 + $0x1e0] sm:$0xff] }
  0x58   : > { %2983 = vmatprep.subr.bf16.mxu0 %v2982_v62  ;;  %3033 = vmatprep.subr.bf16.mxu1 %v2982_v62  ;;  %v1464_v62 = vld [vmem:[#allocation3 + $0x260] sm:$0xff]  ;;  %v4099_v26 = vpack.c.bf16 %v1301_v23, %v1299_v22  ;;  %v1474_v10 = vld [vmem:[#allocation3 + $0x2b0] sm:$0xff]  ;;  %v1243_v53 = vld [vmem:[#allocation3 + $0x18] sm:$0xff] }
  0x59   : > { %2642 = vmatmul.mubr.msk.f32.vlgmr.msra.gmra.mrb[0].mxu0 %vm315_vm3, %v2630_v51  ;;  %2672 = vmatmul.mubr.msk.f32.vlgmr.msra.gmra.mrb[0].mxu1 %vm315_vm3, %v2644_v2  ;;  %v1289_v51 = vld [vmem:[#allocation3 + $0x170] sm:$0xff]  ;;  %v4078_v1 = vpack.c.bf16 %v1466_v63, %v1464_v62  ;;  %v4102_v31 = vpack.c.bf16 %v1474_v10, %v1472_v27  ;;  %v1476_v45 = vld [vmem:[#allocation3 + $0x2c0] sm:$0xff]  ;;  %v1481_v54 = vld [vmem:[#allocation3 + $0x2e8] sm:$0xff] }
  0x5a   : > { %2985 = vmatpush1.bf16.msra.mxu0 %v2984_v3  ;;  %3035 = vmatpush1.bf16.msra.mxu1 %v2984_v3  ;;  %v4066_v52 = vpack.c.bf16 %v1289_v51, %v1287_v50  ;;  %v1298_v3 = vld [vmem:[#allocation3 + $0x1b8] sm:$0xff]  ;;  %v1305_v41 = vld [vmem:[#allocation3 + $0x1f0] sm:$0xff]  ;;  %v1241_v51 = vld [vmem:[#allocation3 + $0x8] sm:$0xff] }
  0x5b   : > { %696 = vmatprep.mubr.f32.mxu0 %v4678_v0  ;;  %1120 = vmatprep.mubr.f32.mxu1 %v4678_v0  ;;  %v4111_v44 = vpack.c.bf16 %v1305_v41, %v1303_v38  ;;  %v1478_v46 = vld [vmem:[#allocation3 + $0x2d0] sm:$0xff]  ;;  %v4119_v55 = vpack.c.bf16 %v1243_v53, %v1241_v51  ;;  %v1483_v57 = vld [vmem:[#allocation3 + $0x2f8] sm:$0xff]  ;;  %v1245_v51 = vld [vmem:[#allocation3 + $0x28] sm:$0xff] }
  0x5c   : > { %2988 = vmatprep.subr.msk.bf16.mxu0 %vm3818_vm2, %v2986_v6  ;;  %3038 = vmatprep.subr.msk.bf16.mxu1 %vm3818_vm2, %v2986_v6  ;;  %v1471_v6 = vld [vmem:[#allocation3 + $0x298] sm:$0xff]  ;;  %v4114_v50 = vpack.c.bf16 %v1478_v46, %v1476_v45  ;;  %v1482_v62 = vld [vmem:[#allocation3 + $0x2f0] sm:$0xff]  ;;  %v1240_v45 = vld [vmem:[#allocation3] sm:$0xff] }
  0x5d   : > { %2643 = vmatmul.mubr.msk.f32.gmra.mrb[2].mxu0 %vm315_vm3, %v2631_v58  ;;  %2673 = vmatmul.mubr.msk.f32.gmra.mrb[2].mxu1 %vm315_vm3, %v2645_v12  ;;  %v1291_v58 = vld [vmem:[#allocation3 + $0x180] sm:$0xff]  ;;  %v4085_v9 = vpack.c.bf16 %v1471_v6, %v1469_v4  ;;  %v2680_v17 = vld [vmem:[%s4669_s2] ss:$0 sm:$0xff]  ;;  %v1247_v53 = vld [vmem:[#allocation3 + $0x38] sm:$0xff] }
  0x5e   : > { %2991 = vmatpush1.bf16.msk.msra.mxu0 %vm3818_vm2, %v2989_v13  ;;  %3041 = vmatpush1.bf16.msk.msra.mxu1 %vm3818_vm2, %v2989_v13  ;;  %v4075_v61 = vpack.c.bf16 %v1293_v59, %v1291_v58  ;;  %v1470_v13 = vld [vmem:[#allocation3 + $0x290] sm:$0xff]  ;;  %4704 = vst [vmem:[#allocation9_spill] sm:$0xff] %v4114_v50  ;;  %v4121_v58 = vpack.c.bf16 %v1483_v57, %v1481_v54  ;;  %v1480_v59 = vld [vmem:[#allocation3 + $0x2e0] sm:$0xff] }
  0x5f   : > { %796 = vmatprep.mubr.f32.mxu0 %v4678_v0  ;;  %1205 = vmatprep.mubr.f32.mxu1 %v4678_v0  ;;  %v4124_v63 = vpack.c.bf16 %v1482_v62, %v1480_v59  ;;  %v1242_v46 = vld [vmem:[#allocation3 + $0x10] sm:$0xff]  ;;  %v1244_v57 = vld [vmem:[#allocation3 + $0x20] sm:$0xff] }
  0x60   : > { %3043 = vmatprep.subr.bf16.mxu1 %v4011_v16  ;;  %3107 = vmatprep.subr.bf16.mxu0 %v4013_v18  ;;  %4705 = vst [vmem:[#allocation10_spill] sm:$0xff] %v4121_v58  ;;  %v4134_v54 = vpack.c.bf16 %v1242_v46, %v1240_v45  ;;  %v1246_v59 = vld [vmem:[#allocation3 + $0x30] sm:$0xff]  ;;  %v1560_v62 = vld [vmem:[#allocation3 + $0x300] sm:$0xff] }
  0x61   : > { %2656 = vmatmul.mubr.msk.f32.vlgmr.msra.gmra.mrb[0].mxu0 %vm315_vm3, %v2644_v2  ;;  %2678 = vmatmul.mubr.msk.f32.vlgmr.msra.gmra.mrb[0].mxu1 %vm315_vm3, %v2674_v24  ;;  %v1296_v2 = vld [vmem:[#allocation3 + $0x1a8] sm:$0xff]  ;;  %v4097_v24 = vpack.c.bf16 %v1475_v21, %v1473_v19  ;;  %4706 = vst [vmem:[#allocation11_spill] sm:$0xff] %v4124_v63  ;;  %v1252_v46 = vld [vmem:[#allocation3 + $0x60] sm:$0xff] }
  0x62   : > { %802 = vmatprep.mubr.f32.mxu0 %v4678_v0  ;;  %1211 = vmatprep.mubr.f32.mxu1 %v4678_v0  ;;  %v4083_v5 = vpack.c.bf16 %v1298_v3, %v1296_v2  ;;  %v1561_v2 = vld [vmem:[#allocation3 + $0x308] sm:$0xff]  ;;  %v1563_v3 = vld [vmem:[#allocation3 + $0x318] sm:$0xff] }
  0x63   : > { %3045 = vmatpush1.bf16.msra.mxu1 %v4024_v25  ;;  %3109 = vmatpush1.bf16.msra.mxu0 %v4026_v28  ;;  %v4128_v4 = vpack.c.bf16 %v1563_v3, %v1561_v2  ;;  %v4136_v2 = vpack.c.bf16 %v1247_v53, %v1245_v51  ;;  %v1562_v3 = vld [vmem:[#allocation3 + $0x310] sm:$0xff] }
  0x64   : > { %3047 = vmatprep.subr.bf16.mxu1 %v4029_v29  ;;  %3111 = vmatprep.subr.bf16.mxu0 %v4032_v30  ;;  %v1254_v51 = vld [vmem:[#allocation3 + $0x70] sm:$0xff] }
  0x65   : > { %2657 = vmatmul.mubr.msk.f32.gmra.mrb[2].mxu0 %vm315_vm3, %v2645_v12  ;;  %2679 = vmatmul.mubr.msk.f32.gmra.mrb[2].mxu1 %vm315_vm3, %v2675_v36  ;;  %v1468_v12 = vld [vmem:[#allocation3 + $0x280] sm:$0xff]  ;;  %v1479_v36 = vld [vmem:[#allocation3 + $0x2d8] sm:$0xff]  ;;  %4707 = vst [vmem:[#allocation12_spill] sm:$0xff] %v4128_v4 }
  0x66   : > { %1371 = vmatprep.mubr.f32.mxu1 %v4678_v0  ;;  %1548 = vmatprep.mubr.f32.mxu0 %v4678_v0  ;;  %v4090_v14 = vpack.c.bf16 %v1470_v13, %v1468_v12  ;;  %v4109_v43 = vpack.c.bf16 %v1479_v36, %v1477_v34 }
  0x67   : > { %3049 = vmatpush1.bf16.msra.mxu1 %v4040_v37  ;;  %3113 = vmatpush1.bf16.msra.mxu0 %v4043_v39 }
  0x68   : > { %3051 = vmatprep.subr.bf16.mxu1 %v4046_v40  ;;  %3115 = vmatprep.subr.bf16.mxu0 %v4049_v42 }
  0x6b   : > { %3053 = vmatpush1.bf16.msra.mxu1 %v4056_v47  ;;  %3117 = vmatpush1.bf16.msra.mxu0 %v4059_v48 }
  0x6c   : > { %3055 = vmatprep.subr.bf16.mxu1 %v4062_v49  ;;  %3119 = vmatprep.subr.bf16.mxu0 %v4073_v60 }
  0x6f   : > { %3057 = vmatpush1.bf16.msra.mxu1 %v4066_v52  ;;  %3121 = vmatpush1.bf16.msra.mxu0 %v4078_v1 }
  0x70   : > { %3059 = vmatprep.subr.bf16.mxu1 %v4071_v56  ;;  %3123 = vmatprep.subr.bf16.mxu0 %v4085_v9 }
  0x73   : > { %3061 = vmatpush1.bf16.msra.mxu1 %v4075_v61  ;;  %3125 = vmatpush1.bf16.msra.mxu0 %v4090_v14 }
  0x74   : > { %3063 = vmatprep.subr.bf16.mxu1 %v4083_v5  ;;  %3127 = vmatprep.subr.bf16.mxu0 %v4097_v24 }
  0x77   : > { %3065 = vmatpush1.bf16.msra.mxu1 %v4087_v11  ;;  %3129 = vmatpush1.bf16.msra.mxu0 %v4102_v31 }
  0x78   : > { %3067 = vmatprep.subr.bf16.mxu1 %v4095_v20  ;;  %3131 = vmatprep.subr.bf16.mxu0 %v4109_v43 }
  0x7b   : > { %3069 = vmatpush1.bf16.msra.mxu1 %v4099_v26  ;;  %3133 = vmatpush1.bf16.msra.mxu0 %v4114_v50  ;;  %v1591_v50 = vld [vmem:[#allocation3 + $0x3f8] sm:$0xff] }
  0x7c   : > { %3071 = vmatprep.subr.bf16.mxu1 %v4107_v35  ;;  %3135 = vmatprep.subr.bf16.mxu0 %v4121_v58  ;;  %v1585_v58 = vld [vmem:[#allocation3 + $0x3c8] sm:$0xff] }
  0x7f   : > { %3073 = vmatpush1.bf16.msra.mxu1 %v4111_v44  ;;  %3137 = vmatpush1.bf16.msra.mxu0 %v4124_v63  ;;  %v1271_v63 = vld [vmem:[#allocation3 + $0xf8] sm:$0xff] }
  0x80   : > { %3075 = vmatprep.subr.bf16.mxu1 %v4119_v55  ;;  %3139 = vmatprep.subr.bf16.mxu0 %v4128_v4  ;;  %v1581_v4 = vld [vmem:[#allocation3 + $0x3a8] sm:$0xff] }
 0x134   : > { %v798_v6 = vpop.f32.mrb[0].mxu0  ;;  %v1207_v7 = vpop.f32.mrb[0].mxu1 }
 0x135   : > { %v800_v8 = vpop.f32.mrb[1].mxu0  ;;  %v1209_v12 = vpop.f32.mrb[1].mxu1 }
 0x136   : > { %v813_v13 = vmax.f32 %v798_v6, %v800_v8  ;;  %v1222_v15 = vmax.f32 %v1207_v7, %v1209_v12  ;;  %v1249_v6 = vld [vmem:[#allocation3 + $0x48] sm:$0xff]  ;;  %v1251_v7 = vld [vmem:[#allocation3 + $0x58] sm:$0xff] }
 0x137   : > { %v1565_v12 = vld [vmem:[#allocation3 + $0x328] sm:$0xff] }
 0x138   : > { %v1224_v19 = vmax.f32 %v813_v13, %v1222_v15  ;;  %v804_v21 = vpop.f32.mrb[2].mxu0  ;;  %v1213_v22 = vpop.f32.mrb[2].mxu1  ;;  %v1567_v13 = vld [vmem:[#allocation3 + $0x338] sm:$0xff]  ;;  %v4142_v15 = vpack.c.bf16 %v1246_v59, %v1244_v57  ;;  %v1568_v59 = vld [vmem:[#allocation3 + $0x340] sm:$0xff] }
 0x139   : > { %v806_v23 = vpop.f32.mrb[3].mxu0  ;;  %v1215_v27 = vpop.f32.mrb[3].mxu1 }
 0x13a   : > { %v1233_v10 = vadd.f32 %v2680_v17, %v1224_v19  ;;  %v814_v32 = vmax.f32 %v804_v21, %v806_v23  ;;  %v1223_v33 = vmax.f32 %v1213_v22, %v1215_v27  ;;  %v1248_v19 = vld [vmem:[#allocation3 + $0x40] sm:$0xff]  ;;  %v1250_v21 = vld [vmem:[#allocation3 + $0x50] sm:$0xff]  ;;  %v4148_v23 = vpack.c.bf16 %v1251_v7, %v1249_v6  ;;  %v1259_v6 = vld [vmem:[#allocation3 + $0x98] sm:$0xff] }
 0x13b   : > { %v1564_v22 = vld [vmem:[#allocation3 + $0x320] sm:$0xff]  ;;  %v4150_v27 = vpack.c.bf16 %v1567_v13, %v1565_v12  ;;  %v1573_v7 = vld [vmem:[#allocation3 + $0x368] sm:$0xff]  ;;  %v1575_v12 = vld [vmem:[#allocation3 + $0x378] sm:$0xff]  ;;  %v4170_v13 = vpack.c.bf16 %v1254_v51, %v1252_v46 }
 0x13c   : > { %v1235_v34 = vmax.f32 %v1233_v10, 0.0  ;;  %v1225_v36 = vmax.f32 %v814_v32, %v1223_v33  ;;  %v1566_v10 = vld [vmem:[#allocation3 + $0x330] sm:$0xff]  ;;  %v1253_v32 = vld [vmem:[#allocation3 + $0x68] sm:$0xff]  ;;  %v1255_v33 = vld [vmem:[#allocation3 + $0x78] sm:$0xff] }
 0x13d   : > { %4709 = vst [vmem:[#allocation14_spill] sm:$0xff] %v4150_v27  ;;  %v4159_v45 = vpack.c.bf16 %v1566_v10, %v1564_v22  ;;  %v4163_v53 = vpack.c.bf16 %v1255_v33, %v1253_v32  ;;  %v1258_v22 = vld [vmem:[#allocation3 + $0x90] sm:$0xff]  ;;  %v4178_v32 = vpack.c.bf16 %v1575_v12, %v1573_v7  ;;  %v1572_v33 = vld [vmem:[#allocation3 + $0x360] sm:$0xff] }
 0x13e   : > { %1237 = vst [vmem:[#allocation2] sm:$0xff] %v1235_v34  ;;  %v1234_v38 = vadd.f32 %v2680_v17, %v1225_v36  ;;  %v4144_v17 = vpack.c.bf16 %v1562_v3, %v1560_v62  ;;  %v1569_v36 = vld [vmem:[#allocation3 + $0x348] sm:$0xff]  ;;  %v1570_v62 = vld [vmem:[#allocation3 + $0x350] sm:$0xff]  ;;  %v1576_v7 = vld [vmem:[#allocation3 + $0x380] sm:$0xff] }
 0x13f   : > { %4710 = vst [vmem:[#allocation15_spill] sm:$0xff] %v4159_v45  ;;  %v1257_v3 = vld [vmem:[#allocation3 + $0x88] sm:$0xff]  ;;  %4713 = vst [vmem:[#allocation18_spill] sm:$0xff] %v4178_v32  ;;  %v1578_v12 = vld [vmem:[#allocation3 + $0x390] sm:$0xff] }
 0x140   : > { %v1236_v41 = vmax.f32 %v1234_v38, 0.0  ;;  %4708 = vst [vmem:[#allocation13_spill] sm:$0xff] %v4144_v17  ;;  %v1571_v38 = vld [vmem:[#allocation3 + $0x358] sm:$0xff]  ;;  %v4176_v10 = vpack.c.bf16 %v1259_v6, %v1257_v3 }
 0x141   : > { %v4165_v57 = vpack.c.bf16 %v1571_v38, %v1569_v36  ;;  %v1574_v36 = vld [vmem:[#allocation3 + $0x370] sm:$0xff]  ;;  %v1261_v38 = vld [vmem:[#allocation3 + $0xa8] sm:$0xff] }
 0x142   : > { %1238 = vst [vmem:[#allocation2 + $0x8] sm:$0xf] %v1236_v41  ;;  %v4157_v41 = vpack.c.bf16 %v1250_v21, %v1248_v19  ;;  %v4172_v19 = vpack.c.bf16 %v1570_v62, %v1568_v59  ;;  %v1256_v21 = vld [vmem:[#allocation3 + $0x80] sm:$0xff]  ;;  %v4184_v51 = vpack.c.bf16 %v1574_v36, %v1572_v33  ;;  %v1262_v62 = vld [vmem:[#allocation3 + $0xb0] sm:$0xff] }
 0x143   : > { %4711 = vst [vmem:[#allocation16_spill] sm:$0xff] %v4165_v57  ;;  %v4182_v46 = vpack.c.bf16 %v1258_v22, %v1256_v21  ;;  %v1260_v59 = vld [vmem:[#allocation3 + $0xa0] sm:$0xff]  ;;  %v4196_v22 = vpack.c.bf16 %v1578_v12, %v1576_v7  ;;  %v1266_v36 = vld [vmem:[#allocation3 + $0xd0] sm:$0xff] }
 0x144   : > { %4712 = vst [vmem:[#allocation17_spill] sm:$0xff] %v4172_v19  ;;  %4714 = vst [vmem:[#allocation19_spill] sm:$0xff] %v4184_v51  ;;  %v4194_v21 = vpack.c.bf16 %v1262_v62, %v1260_v59  ;;  %v1264_v33 = vld [vmem:[#allocation3 + $0xc0] sm:$0xff]  ;;  %v1586_v12 = vld [vmem:[#allocation3 + $0x3d0] sm:$0xff] }
 0x145   : > { %v4138_v8 = vld [vmem:[#allocation2 + $0x1] ss:$2 sm:$0xf]  ;;  %v4206_v59 = vpack.c.bf16 %v1266_v36, %v1264_v33  ;;  %v1268_v7 = vld [vmem:[#allocation3 + $0xe0] sm:$0xff] }
 0x146   : > { %1372 = vmatmul.mubr.f32.vlgmr.msra.gmra.mrb[4].mxu1 %v4138_v8 }
 0x147   : > { %3077 = vmatpush1.bf16.msra.mxu1 %v4134_v54  ;;  %1442 = vmatprep.mubr.f32.mxu1 %v4678_v0 }
 0x148   : > { %3079 = vmatprep.subr.bf16.mxu1 %v4136_v2 }
 0x149   : > { %v4152_v34 = vld [vmem:[#allocation2 + $0x2] ss:$2 sm:$0xf] }
 0x14a   : > { %1549 = vmatmul.mubr.f32.vlgmr.msra.gmra.mrb[4].mxu0 %v4152_v34 }
 0x14b   : > { %3081 = vmatpush1.bf16.msra.mxu1 %v4142_v15  ;;  %3141 = vmatpush1.bf16.msra.mxu0 %v4144_v17  ;;  %v1267_v17 = vld [vmem:[#allocation3 + $0xd8] sm:$0xff] }
 0x14c   : > { %3083 = vmatprep.subr.bf16.mxu1 %v4148_v23  ;;  %3143 = vmatprep.subr.bf16.mxu0 %v4150_v27  ;;  %v1577_v27 = vld [vmem:[#allocation3 + $0x388] sm:$0xff] }
 0x14d   : > { %1656 = vmatprep.mubr.f32.mxu0 %v4678_v0  ;;  %v1263_v0 = vld [vmem:[#allocation3 + $0xb8] sm:$0xff] }
 0x14e   : > { %v4188_v3 = vpack.c.bf16 %v1263_v0, %v1261_v38  ;;  %v1582_v38 = vld [vmem:[#allocation3 + $0x3b0] sm:$0xff] }
 0x14f   : > { %3085 = vmatpush1.bf16.msra.mxu1 %v4157_v41  ;;  %3145 = vmatpush1.bf16.msra.mxu0 %v4159_v45  ;;  %v1579_v45 = vld [vmem:[#allocation3 + $0x398] sm:$0xff] }
 0x150   : > { %3087 = vmatprep.subr.bf16.mxu1 %v4163_v53  ;;  %3147 = vmatprep.subr.bf16.mxu0 %v4165_v57  ;;  %v4190_v6 = vpack.c.bf16 %v1579_v45, %v1577_v27  ;;  %v1265_v57 = vld [vmem:[#allocation3 + $0xc8] sm:$0xff]  ;;  %v1580_v45 = vld [vmem:[#allocation3 + $0x3a0] sm:$0xff] }
 0x151   : > { %v4200_v0 = vpack.c.bf16 %v1267_v17, %v1265_v57  ;;  %v4208_v62 = vpack.c.bf16 %v1582_v38, %v1580_v45  ;;  %v1270_v57 = vld [vmem:[#allocation3 + $0xf0] sm:$0xff]  ;;  %v1671_v45 = vld [vmem:[#allocation3 + $0x418] sm:$0xff] }
 0x152   : > { %4715 = vst [vmem:[#allocation20_spill] sm:$0xff] %v4190_v6  ;;  %v4218_v33 = vpack.c.bf16 %v1270_v57, %v1268_v7  ;;  %v1668_v57 = vld [vmem:[#allocation3 + $0x400] sm:$0xff] }
 0x153   : > { %3089 = vmatpush1.bf16.msra.mxu1 %v4170_v13  ;;  %3149 = vmatpush1.bf16.msra.mxu0 %v4172_v19  ;;  %v1583_v19 = vld [vmem:[#allocation3 + $0x3b8] sm:$0xff] }
 0x154   : > { %3091 = vmatprep.subr.bf16.mxu1 %v4176_v10  ;;  %3151 = vmatprep.subr.bf16.mxu0 %v4178_v32  ;;  %v4202_v27 = vpack.c.bf16 %v1583_v19, %v1581_v4  ;;  %v1269_v32 = vld [vmem:[#allocation3 + $0xe8] sm:$0xff]  ;;  %v1584_v19 = vld [vmem:[#allocation3 + $0x3c0] sm:$0xff] }
 0x155   : > { %v4212_v4 = vpack.c.bf16 %v1271_v63, %v1269_v32  ;;  %v4220_v36 = vpack.c.bf16 %v1586_v12, %v1584_v19  ;;  %v1590_v32 = vld [vmem:[#allocation3 + $0x3f0] sm:$0xff]  ;;  %v1675_v12 = vld [vmem:[#allocation3 + $0x438] sm:$0xff] }
 0x156   : > { %v1670_v19 = vld [vmem:[#allocation3 + $0x410] sm:$0xff] }
 0x157   : > { %3093 = vmatpush1.bf16.msra.mxu1 %v4182_v46  ;;  %3153 = vmatpush1.bf16.msra.mxu0 %v4184_v51  ;;  %v1587_v51 = vld [vmem:[#allocation3 + $0x3d8] sm:$0xff]  ;;  %4717 = vst [vmem:[#allocation22_spill] sm:$0xff] %v4220_v36 }
 0x158   : > { %3095 = vmatprep.subr.bf16.mxu1 %v4188_v3  ;;  %3155 = vmatprep.subr.bf16.mxu0 %v4190_v6  ;;  %v4214_v17 = vpack.c.bf16 %v1587_v51, %v1585_v58  ;;  %v1589_v6 = vld [vmem:[#allocation3 + $0x3e8] sm:$0xff]  ;;  %v1588_v58 = vld [vmem:[#allocation3 + $0x3e0] sm:$0xff] }
 0x159   : > { %v4224_v63 = vpack.c.bf16 %v1591_v50, %v1589_v6  ;;  %v1669_v51 = vld [vmem:[#allocation3 + $0x408] sm:$0xff]  ;;  %v4228_v38 = vpack.c.bf16 %v1590_v32, %v1588_v58  ;;  %v1239_v50 = vld [vmem:[#allocation2] ss:$2 sm:$0xf] }
 0x15a   : > { %4716 = vst [vmem:[#allocation21_spill] sm:$0xff] %v4214_v17  ;;  %v4232_v7 = vpack.c.bf16 %v1671_v45, %v1669_v51  ;;  %v1673_v6 = vld [vmem:[#allocation3 + $0x428] sm:$0xff]  ;;  %v1674_v32 = vld [vmem:[#allocation3 + $0x430] sm:$0xff] }
 0x15b   : > { %3097 = vmatpush1.bf16.msra.mxu1 %v4194_v21  ;;  %3157 = vmatpush1.bf16.msra.mxu0 %v4196_v22  ;;  %4718 = vst [vmem:[#allocation23_spill] sm:$0xff] %v4224_v63  ;;  %v4240_v58 = vpack.c.bf16 %v1675_v12, %v1673_v6  ;;  %v4242_v51 = vld [vmem:[#allocation2 + $0x3] ss:$2 sm:$0xf]  ;;  %v1677_v45 = vld [vmem:[#allocation3 + $0x448] sm:$0xff] }
 0x15c   : > { %3099 = vmatprep.subr.bf16.mxu1 %v4200_v0  ;;  %3159 = vmatprep.subr.bf16.mxu0 %v4202_v27  ;;  %v1683_v6 = vld [vmem:[#allocation3 + $0x478] sm:$0xff] }
 0x15f   : > { %3101 = vmatpush1.bf16.msra.mxu1 %v4206_v59  ;;  %3161 = vmatpush1.bf16.msra.mxu0 %v4208_v62 }
 0x160   : > { %3103 = vmatprep.subr.bf16.mxu1 %v4212_v4  ;;  %3163 = vmatprep.subr.bf16.mxu0 %v4214_v17  ;;  %v4236_v17 = vpack.c.bf16 %v1670_v19, %v1668_v57  ;;  %v1676_v57 = vld [vmem:[#allocation3 + $0x440] sm:$0xff]  ;;  %v1678_v19 = vld [vmem:[#allocation3 + $0x450] sm:$0xff] }
 0x161   : > { %v4257_v12 = vpack.c.bf16 %v1678_v19, %v1676_v57  ;;  %v1684_v57 = vld [vmem:[#allocation3 + $0x480] sm:$0xff]  ;;  %v1689_v19 = vld [vmem:[#allocation3 + $0x4a8] sm:$0xff] }
 0x163   : > { %3105 = vmatpush1.bf16.msra.mxu1 %v4218_v33  ;;  %3165 = vmatpush1.bf16.msra.mxu0 %v4220_v36  ;;  %v4719_v36 = vmov 0.0  }
 0x164   : > { %3167 = vmatprep.subr.bf16.mxu0 %v4224_v63  ;;  %3203 = vmatprep.subr.bf16.mxu1 %v4011_v16  ;;  %v1672_v16 = vld [vmem:[#allocation3 + $0x420] sm:$0xff]  ;;  %v1679_v63 = vld [vmem:[#allocation3 + $0x458] sm:$0xff] }
 0x166   : > { %1443 = vmatmul.mubr.f32.vlgmr.msra.gmra.mrb[4].mxu1 %v1239_v50  ;;  %v1681_v50 = vld [vmem:[#allocation3 + $0x468] sm:$0xff] }
 0x167   : > { %3169 = vmatpush1.bf16.msra.mxu0 %v4228_v38  ;;  %3205 = vmatpush1.bf16.msra.mxu1 %v4024_v25  ;;  %v4248_v25 = vpack.c.bf16 %v1674_v32, %v1672_v16  ;;  %v1685_v16 = vld [vmem:[#allocation3 + $0x488] sm:$0xff]  ;;  %v1687_v32 = vld [vmem:[#allocation3 + $0x498] sm:$0xff] }
 0x168   : > { %3171 = vmatprep.subr.bf16.mxu0 %v4232_v7  ;;  %3207 = vmatprep.subr.bf16.mxu1 %v4029_v29  ;;  %v4252_v29 = vpack.c.bf16 %v1679_v63, %v1677_v45  ;;  %v1682_v63 = vld [vmem:[#allocation3 + $0x470] sm:$0xff] }
 0x169   : > { %1838 = vmatprep.mubr.f32.mxu1 %v4719_v36 }
 0x16a   : > { %1657 = vmatmul.mubr.f32.vlgmr.msra.gmra.mrb[4].mxu0 %v4242_v51 }
 0x16b   : > { %3173 = vmatpush1.bf16.msra.mxu0 %v4236_v17  ;;  %3209 = vmatpush1.bf16.msra.mxu1 %v4040_v37  ;;  %v4261_v37 = vpack.c.bf16 %v1683_v6, %v1681_v50  ;;  %v1691_v50 = vld [vmem:[#allocation3 + $0x4b8] sm:$0xff] }
 0x16c   : > { %3175 = vmatprep.subr.bf16.mxu0 %v4240_v58  ;;  %3211 = vmatprep.subr.bf16.mxu1 %v4046_v40  ;;  %v1680_v40 = vld [vmem:[#allocation3 + $0x460] sm:$0xff] }
 0x16d   : > { %1764 = vmatprep.mubr.f32.mxu0 %v4719_v36  ;;  %v4265_v45 = vpack.c.bf16 %v1682_v63, %v1680_v40  ;;  %v1688_v40 = vld [vmem:[#allocation3 + $0x4a0] sm:$0xff]  ;;  %v1693_v63 = vld [vmem:[#allocation3 + $0x4c8] sm:$0xff] }
 0x16f   : > { %3177 = vmatpush1.bf16.msra.mxu0 %v4248_v25  ;;  %3213 = vmatpush1.bf16.msra.mxu1 %v4056_v47  ;;  %v4269_v47 = vpack.c.bf16 %v1687_v32, %v1685_v16  ;;  %v1695_v16 = vld [vmem:[#allocation3 + $0x4d8] sm:$0xff] }
 0x170   : > { %3179 = vmatprep.subr.bf16.mxu0 %v4252_v29  ;;  %3215 = vmatprep.subr.bf16.mxu1 %v4062_v49  ;;  %v1686_v49 = vld [vmem:[#allocation3 + $0x490] sm:$0xff] }
 0x171   : > { %v4273_v6 = vpack.c.bf16 %v1686_v49, %v1684_v57  ;;  %v1692_v57 = vld [vmem:[#allocation3 + $0x4c0] sm:$0xff]  ;;  %v1697_v49 = vld [vmem:[#allocation3 + $0x4e8] sm:$0xff] }
 0x173   : > { %3181 = vmatpush1.bf16.msra.mxu0 %v4257_v12  ;;  %3217 = vmatpush1.bf16.msra.mxu1 %v4066_v52  ;;  %v4277_v52 = vpack.c.bf16 %v1691_v50, %v1689_v19  ;;  %v1699_v19 = vld [vmem:[#allocation3 + $0x4f8] sm:$0xff] }
 0x174   : > { %3183 = vmatprep.subr.bf16.mxu0 %v4261_v37  ;;  %3219 = vmatprep.subr.bf16.mxu1 %v4071_v56  ;;  %v1690_v56 = vld [vmem:[#allocation3 + $0x4b0] sm:$0xff] }
 0x175   : > { %v4281_v32 = vpack.c.bf16 %v1690_v56, %v1688_v40  ;;  %v1696_v40 = vld [vmem:[#allocation3 + $0x4e0] sm:$0xff] }
 0x177   : > { %3185 = vmatpush1.bf16.msra.mxu0 %v4265_v45  ;;  %3221 = vmatpush1.bf16.msra.mxu1 %v4075_v61  ;;  %v4285_v61 = vpack.c.bf16 %v1695_v16, %v1693_v63 }
 0x178   : > { %3187 = vmatprep.subr.bf16.mxu0 %v4269_v47  ;;  %3223 = vmatprep.subr.bf16.mxu1 %v4083_v5  ;;  %v1694_v5 = vld [vmem:[#allocation3 + $0x4d0] sm:$0xff] }
 0x179   : > { %v4289_v50 = vpack.c.bf16 %v1694_v5, %v1692_v57  ;;  %v2682_v57 = vld [vmem:[%s4672_s5 + $0x80] sm:$0xff]  ;;  %v2683_v5 = vld [vmem:[%s4672_s5 + $0x88] sm:$0xff] }
 0x17b   : > { %3189 = vmatpush1.bf16.msra.mxu0 %v4273_v6  ;;  %3225 = vmatpush1.bf16.msra.mxu1 %v4087_v11  ;;  %v4293_v11 = vpack.c.bf16 %v1699_v19, %v1697_v49  ;;  %v3387_v19 = vpack.c.bf16 %v2683_v5, %v2682_v57  ;;  %v2722_v5 = vld [vmem:[%s4672_s5 + $0x1c0] sm:$0xff] }
 0x17c   : > { %3191 = vmatprep.subr.bf16.mxu0 %v4277_v52  ;;  %3227 = vmatprep.subr.bf16.mxu1 %v4095_v20  ;;  %v1698_v20 = vld [vmem:[#allocation3 + $0x4f0] sm:$0xff] }
 0x17d   : > { %v4297_v56 = vpack.c.bf16 %v1698_v20, %v1696_v40  ;;  %v2685_v40 = vld [vmem:[%s4672_s5 + $0x98] sm:$0xff] }
 0x17f   : > { %3193 = vmatpush1.bf16.msra.mxu0 %v4281_v32  ;;  %3229 = vmatpush1.bf16.msra.mxu1 %v4099_v26  ;;  %v4306_v26 = vld [vmem:[#allocation2 + $0x4] ss:$2 sm:$0xf] }
 0x180   : > { %3195 = vmatprep.subr.bf16.mxu0 %v4285_v61  ;;  %3231 = vmatprep.subr.bf16.mxu1 %v4107_v35  ;;  %v4732_v35 = vld [vmem:[#allocation21_spill] sm:$0xff] }
 0x183   : > { %3197 = vmatpush1.bf16.msra.mxu0 %v4289_v50  ;;  %3233 = vmatpush1.bf16.msra.mxu1 %v4111_v44  ;;  %v4734_v44 = vld [vmem:[#allocation23_spill] sm:$0xff] }
 0x184   : > { %3199 = vmatprep.subr.bf16.mxu0 %v4293_v11  ;;  %3235 = vmatprep.subr.bf16.mxu1 %v4119_v55  ;;  %v2149_v55 = vld [vmem:[%s4672_s5] sm:$0xff] }
 0x186   : > { %1839 = vmatmul.mubr.f32.vlgmr.msra.gmra.mrb[6].mxu1 %v4152_v34 }
 0x187   : > { %3201 = vmatpush1.bf16.msra.mxu0 %v4297_v56  ;;  %3237 = vmatpush1.bf16.msra.mxu1 %v4134_v54  ;;  %v2150_v54 = vld [vmem:[%s4672_s5 + $0x8] sm:$0xff] }
 0x188   : > { %3239 = vmatprep.subr.bf16.mxu1 %v4136_v2  ;;  %1909 = vmatprep.mubr.f32.mxu1 %v4719_v36  ;;  %v2151_v2 = vld [vmem:[%s4672_s5 + $0x10] sm:$0xff] }
 0x18a   : > { %1765 = vmatmul.mubr.f32.vlgmr.msra.gmra.mrb[4].mxu0 %v4306_v26 }
 0x18b   : > { %3241 = vmatpush1.bf16.msra.mxu1 %v4142_v15  ;;  %v3363_v15 = vpack.c.bf16 %v2150_v54, %v2149_v55  ;;  %2834 = vmatprep.mubr.msk.f32.mxu0 %vm3671_vm4, %v4719_v36  ;;  %v2698_v54 = vld [vmem:[%s4672_s5 + $0x100] sm:$0xff] }
 0x18c   : > { %3243 = vmatprep.subr.bf16.mxu1 %v4148_v23  ;;  %v2152_v23 = vld [vmem:[%s4672_s5 + $0x18] sm:$0xff] }
 0x18d   : > { %v3366_v34 = vpack.c.bf16 %v2152_v23, %v2151_v2  ;;  %v2699_v2 = vld [vmem:[%s4672_s5 + $0x108] sm:$0xff] }
 0x18f   : > { %3245 = vmatpush1.bf16.msra.mxu1 %v4157_v41  ;;  %v2153_v41 = vld [vmem:[%s4672_s5 + $0x20] sm:$0xff] }
 0x190   : > { %3247 = vmatprep.subr.bf16.mxu1 %v4163_v53  ;;  %v2154_v53 = vld [vmem:[%s4672_s5 + $0x28] sm:$0xff] }
 0x193   : > { %3249 = vmatpush1.bf16.msra.mxu1 %v4170_v13  ;;  %v3369_v13 = vpack.c.bf16 %v2154_v53, %v2153_v41  ;;  %v2701_v41 = vld [vmem:[%s4672_s5 + $0x118] sm:$0xff] }
 0x194   : > { %3251 = vmatprep.subr.bf16.mxu1 %v4176_v10  ;;  %v2155_v10 = vld [vmem:[%s4672_s5 + $0x30] sm:$0xff] }
 0x197   : > { %3253 = vmatpush1.bf16.msra.mxu1 %v4182_v46  ;;  %v2156_v46 = vld [vmem:[%s4672_s5 + $0x38] sm:$0xff] }
 0x198   : > { %3255 = vmatprep.subr.bf16.mxu1 %v4188_v3  ;;  %v3372_v3 = vpack.c.bf16 %v2156_v46, %v2155_v10  ;;  %v2703_v10 = vld [vmem:[%s4672_s5 + $0x128] sm:$0xff] }
 0x19b   : > { %3257 = vmatpush1.bf16.msra.mxu1 %v4194_v21  ;;  %v2157_v21 = vld [vmem:[%s4672_s5 + $0x40] sm:$0xff] }
 0x19c   : > { %3259 = vmatprep.subr.bf16.mxu1 %v4200_v0 }
 0x19f   : > { %3261 = vmatpush1.bf16.msra.mxu1 %v4206_v59  ;;  %v2160_v59 = vld [vmem:[%s4672_s5 + $0x58] sm:$0xff] }
 0x1a0   : > { %3263 = vmatprep.subr.bf16.mxu1 %v4212_v4  ;;  %v2063_v4 = vld [vmem:[#allocation2 + $0x5] ss:$2 sm:$0xf] }
 0x1a3   : > { %3265 = vmatpush1.bf16.msra.mxu1 %v4218_v33 }
 0x1a4   : > { %3267 = vmatprep.subr.bf16.mxu1 %v4013_v18  ;;  %v4720_v18 = vld [vmem:[#allocation9_spill] sm:$0xff] }
 0x1a6   : > { %1910 = vmatmul.mubr.f32.vlgmr.msra.gmra.mrb[6].mxu1 %v4138_v8  ;;  %v3670_v8 = vmov 0.0|0.0  }
 0x1a7   : > { %3269 = vmatpush1.bf16.msra.mxu1 %v4026_v28  ;;  %1980 = vmatprep.mubr.f32.mxu1 %v4719_v36  ;;  %v4721_v28 = vld [vmem:[#allocation10_spill] sm:$0xff] }
 0x1a8   : > { %3271 = vmatprep.subr.bf16.mxu1 %v4032_v30  ;;  %v4722_v30 = vld [vmem:[#allocation11_spill] sm:$0xff]  ;;  %3362 = vmatprep.subr.bf16.mxu0 %v3670_v8 }
 0x1a9   : > { %3364 = vmatpush3.bf16.msra.mxu0 %v3363_v15  ;;  %v3411_v15 = vpack.c.bf16 %v2699_v2, %v2698_v54 }
 0x1aa   : > { %3365 = vmatprep.subr.bf16.mxu0 %v3670_v8 }
 0x1ab   : > { %3273 = vmatpush1.bf16.msra.mxu1 %v4043_v39  ;;  %v4723_v39 = vld [vmem:[#allocation12_spill] sm:$0xff] }
 0x1ac   : > { %3275 = vmatprep.subr.bf16.mxu1 %v4049_v42  ;;  %v4724_v42 = vld [vmem:[#allocation13_spill] sm:$0xff] }
 0x1ad   : > { %3367 = vmatpush3.bf16.msra.mxu0 %v3366_v34  ;;  %v2700_v34 = vld [vmem:[%s4672_s5 + $0x110] sm:$0xff] }
 0x1ae   : > { %3368 = vmatprep.subr.bf16.mxu0 %v3670_v8  ;;  %v3414_v53 = vpack.c.bf16 %v2701_v41, %v2700_v34 }
 0x1af   : > { %3277 = vmatpush1.bf16.msra.mxu1 %v4059_v48  ;;  %v4725_v48 = vld [vmem:[#allocation14_spill] sm:$0xff] }
 0x1b0   : > { %3279 = vmatprep.subr.bf16.mxu1 %v4073_v60  ;;  %v4726_v60 = vld [vmem:[#allocation15_spill] sm:$0xff] }
 0x1b1   : > { %3370 = vmatpush3.bf16.msra.mxu0 %v3369_v13  ;;  %v2702_v13 = vld [vmem:[%s4672_s5 + $0x120] sm:$0xff] }
 0x1b2   : > { %3371 = vmatprep.subr.bf16.mxu0 %v3670_v8  ;;  %v3417_v46 = vpack.c.bf16 %v2703_v10, %v2702_v13 }
 0x1b3   : > { %3281 = vmatpush1.bf16.msra.mxu1 %v4078_v1  ;;  %v4727_v1 = vld [vmem:[#allocation16_spill] sm:$0xff] }
 0x1b4   : > { %3283 = vmatprep.subr.bf16.mxu1 %v4085_v9  ;;  %v4728_v9 = vld [vmem:[#allocation17_spill] sm:$0xff] }
 0x1b5   : > { %3373 = vmatpush3.bf16.msra.mxu0 %v3372_v3  ;;  %v2704_v3 = vld [vmem:[%s4672_s5 + $0x130] sm:$0xff] }
 0x1b6   : > { %3374 = vmatprep.subr.bf16.mxu0 %v3670_v8 }
 0x1b7   : > { %3285 = vmatpush1.bf16.msra.mxu1 %v4090_v14  ;;  %v4729_v14 = vld [vmem:[#allocation18_spill] sm:$0xff] }
 0x1b8   : > { %3287 = vmatprep.subr.bf16.mxu1 %v4097_v24  ;;  %v4730_v24 = vld [vmem:[#allocation19_spill] sm:$0xff] }
 0x1bb   : > { %3289 = vmatpush1.bf16.msra.mxu1 %v4102_v31  ;;  %v4731_v31 = vld [vmem:[#allocation20_spill] sm:$0xff] }
 0x1bc   : > { %3291 = vmatprep.subr.bf16.mxu1 %v4109_v43  ;;  %v4733_v43 = vld [vmem:[#allocation22_spill] sm:$0xff] }
 0x1bf   : > { %3293 = vmatpush1.bf16.msra.mxu1 %v4720_v18 }
 0x1c0   : > { %3295 = vmatprep.subr.bf16.mxu1 %v4721_v28  ;;  %v2688_v28 = vld [vmem:[%s4672_s5 + $0xb0] sm:$0xff] }
 0x1c3   : > { %3297 = vmatpush1.bf16.msra.mxu1 %v4722_v30  ;;  %v2689_v30 = vld [vmem:[%s4672_s5 + $0xb8] sm:$0xff] }
 0x1c4   : > { %3299 = vmatprep.subr.bf16.mxu1 %v4723_v39  ;;  %v3396_v39 = vpack.c.bf16 %v2689_v30, %v2688_v28  ;;  %v2728_v28 = vld [vmem:[%s4672_s5 + $0x1f0] sm:$0xff]  ;;  %v2729_v30 = vld [vmem:[%s4672_s5 + $0x1f8] sm:$0xff] }
 0x1c6   : > { %1981 = vmatmul.mubr.f32.vlgmr.msra.gmra.mrb[6].mxu1 %v4242_v51  ;;  %v2163_v51 = vld [vmem:[%s4672_s5 + $0x70] sm:$0xff] }
 0x1c7   : > { %3301 = vmatpush1.bf16.msra.mxu1 %v4724_v42  ;;  %2053 = vmatprep.mubr.f32.mxu1 %v4719_v36  ;;  %v2690_v42 = vld [vmem:[%s4672_s5 + $0xc0] sm:$0xff] }
 0x1c8   : > { %3303 = vmatprep.subr.bf16.mxu1 %v4725_v48  ;;  %v2691_v48 = vld [vmem:[%s4672_s5 + $0xc8] sm:$0xff] }
 0x1cb   : > { %3305 = vmatpush1.bf16.msra.mxu1 %v4726_v60  ;;  %v3399_v60 = vpack.c.bf16 %v2691_v48, %v2690_v42  ;;  %v2148_v48 = vld [vmem:[%s4673_s6] sm:$0x1] }
 0x1cc   : > { %3307 = vmatprep.subr.bf16.mxu1 %v4727_v1  ;;  %v2692_v1 = vld [vmem:[%s4672_s5 + $0xd0] sm:$0xff] }
 0x1cf   : > { %3309 = vmatpush1.bf16.msra.mxu1 %v4728_v9  ;;  %v2693_v9 = vld [vmem:[%s4672_s5 + $0xd8] sm:$0xff] }
 0x1d0   : > { %3311 = vmatprep.subr.bf16.mxu1 %v4729_v14  ;;  %v3402_v14 = vpack.c.bf16 %v2693_v9, %v2692_v1 }
 0x1d3   : > { %3313 = vmatpush1.bf16.msra.mxu1 %v4730_v24  ;;  %v2694_v24 = vld [vmem:[%s4672_s5 + $0xe0] sm:$0xff] }
 0x1d4   : > { %3315 = vmatprep.subr.bf16.mxu1 %v4731_v31  ;;  %v2695_v31 = vld [vmem:[%s4672_s5 + $0xe8] sm:$0xff] }
 0x1d7   : > { %3317 = vmatpush1.bf16.msra.mxu1 %v4196_v22  ;;  %v2158_v22 = vld [vmem:[%s4672_s5 + $0x48] sm:$0xff] }
 0x1d8   : > { %3319 = vmatprep.subr.bf16.mxu1 %v4202_v27  ;;  %v3375_v0 = vpack.c.bf16 %v2158_v22, %v2157_v21  ;;  %v2159_v27 = vld [vmem:[%s4672_s5 + $0x50] sm:$0xff]  ;;  %v2705_v21 = vld [vmem:[%s4672_s5 + $0x138] sm:$0xff] }
 0x1d9   : > { %v3420_v22 = vpack.c.bf16 %v2705_v21, %v2704_v3 }
 0x1da   : > { %3376 = vmatpush3.bf16.msra.mxu0 %v3375_v0  ;;  %v2706_v0 = vld [vmem:[%s4672_s5 + $0x140] sm:$0xff] }
 0x1db   : > { %3321 = vmatpush1.bf16.msra.mxu1 %v4208_v62  ;;  %v3378_v62 = vpack.c.bf16 %v2160_v59, %v2159_v27  ;;  %3377 = vmatprep.subr.bf16.mxu0 %v3670_v8  ;;  %v2707_v27 = vld [vmem:[%s4672_s5 + $0x148] sm:$0xff] }
 0x1dc   : > { %3323 = vmatprep.subr.bf16.mxu1 %v4732_v35  ;;  %v3405_v35 = vpack.c.bf16 %v2695_v31, %v2694_v24  ;;  %v3423_v59 = vpack.c.bf16 %v2707_v27, %v2706_v0 }
 0x1de   : > { %3379 = vmatpush3.bf16.msra.mxu0 %v3378_v62  ;;  %v2708_v62 = vld [vmem:[%s4672_s5 + $0x150] sm:$0xff] }
 0x1df   : > { %3325 = vmatpush1.bf16.msra.mxu1 %v4733_v43  ;;  %3380 = vmatprep.subr.bf16.mxu0 %v3670_v8  ;;  %v2696_v43 = vld [vmem:[%s4672_s5 + $0xf0] sm:$0xff] }
 0x1e0   : > { %3327 = vmatprep.subr.bf16.mxu1 %v4734_v44  ;;  %v2697_v44 = vld [vmem:[%s4672_s5 + $0xf8] sm:$0xff] }
 0x1e1   : > { %v3408_v55 = vpack.c.bf16 %v2697_v44, %v2696_v43 }
 0x1e3   : > { %3329 = vmatpush1.bf16.msra.mxu1 %v4228_v38  ;;  %v2161_v38 = vld [vmem:[%s4672_s5 + $0x60] sm:$0xff] }
 0x1e4   : > { %3331 = vmatprep.subr.bf16.mxu1 %v4232_v7  ;;  %v2162_v7 = vld [vmem:[%s4672_s5 + $0x68] sm:$0xff] }
 0x1e6   : > { %2054 = vmatmul.mubr.f32.vlgmr.msra.gmra.mrb[6].mxu1 %v4306_v26  ;;  %v2687_v26 = vld [vmem:[%s4672_s5 + $0xa8] sm:$0xff] }
 0x1e7   : > { %3333 = vmatpush1.bf16.msra.mxu1 %v4236_v17  ;;  %2128 = vmatprep.mubr.f32.mxu1 %v4719_v36 }
 0x1e8   : > { %3335 = vmatprep.subr.bf16.mxu1 %v4240_v58  ;;  %v3381_v58 = vpack.c.bf16 %v2162_v7, %v2161_v38  ;;  %v2711_v38 = vld [vmem:[%s4672_s5 + $0x168] sm:$0xff] }
 0x1ea   : > { %3382 = vmatpush3.bf16.msra.mxu0 %v3381_v58  ;;  %v2712_v58 = vld [vmem:[%s4672_s5 + $0x170] sm:$0xff] }
 0x1eb   : > { %3337 = vmatpush1.bf16.msra.mxu1 %v4248_v25  ;;  %3383 = vmatprep.subr.bf16.mxu0 %v3670_v8  ;;  %v2164_v25 = vld [vmem:[%s4672_s5 + $0x78] sm:$0xff] }
 0x1ec   : > { %3339 = vmatprep.subr.bf16.mxu1 %v4252_v29 }
 0x1ef   : > { %3341 = vmatpush1.bf16.msra.mxu1 %v4257_v12  ;;  %v3384_v12 = vpack.c.bf16 %v2164_v25, %v2163_v51  ;;  %v2713_v51 = vld [vmem:[%s4672_s5 + $0x178] sm:$0xff] }
 0x1f0   : > { %3343 = vmatprep.subr.bf16.mxu1 %v4261_v37  ;;  %v3432_v25 = vpack.c.bf16 %v2713_v51, %v2712_v58 }
 0x1f1   : > { %3385 = vmatpush3.bf16.msra.mxu0 %v3384_v12  ;;  %v2715_v12 = vld [vmem:[%s4672_s5 + $0x188] sm:$0xff] }
 0x1f2   : > { %3386 = vmatprep.subr.bf16.mxu0 %v3670_v8 }
 0x1f3   : > { %3345 = vmatpush1.bf16.msra.mxu1 %v4265_v45 }
 0x1f4   : > { %3347 = vmatprep.subr.bf16.mxu1 %v4269_v47 }
 0x1f7   : > { %3349 = vmatpush1.bf16.msra.mxu1 %v4273_v6 }
 0x1f8   : > { %3351 = vmatprep.subr.bf16.mxu1 %v4277_v52 }
 0x1fb   : > { %3353 = vmatpush1.bf16.msra.mxu1 %v4281_v32  ;;  %v2681_v32 = vld [vmem:[%s4671_s4] ss:$0 sm:$0xff] }
 0x1fc   : > { %3355 = vmatprep.subr.bf16.mxu1 %v4285_v61 }
 0x1ff   : > { %3357 = vmatpush1.bf16.msra.mxu1 %v4289_v50 }
 0x200   : > { %3359 = vmatprep.subr.bf16.mxu1 %v4293_v11  ;;  %v2684_v11 = vld [vmem:[%s4672_s5 + $0x90] sm:$0xff] }
 0x201   : > { %v3390_v20 = vpack.c.bf16 %v2685_v40, %v2684_v11  ;;  %v2724_v11 = vld [vmem:[%s4672_s5 + $0x1d0] sm:$0xff]  ;;  %v2725_v40 = vld [vmem:[%s4672_s5 + $0x1d8] sm:$0xff] }
 0x203   : > { %3361 = vmatpush1.bf16.msra.mxu1 %v4297_v56  ;;  %v2686_v56 = vld [vmem:[%s4672_s5 + $0xa0] sm:$0xff] }
 0x204   : > { %v3393_v18 = vpack.c.bf16 %v2687_v26, %v2686_v56  ;;  %v2726_v56 = vld [vmem:[%s4672_s5 + $0x1e0] sm:$0xff]  ;;  %v2727_v26 = vld [vmem:[%s4672_s5 + $0x1e8] sm:$0xff] }
 0x206   : > { %2129 = vmatmul.mubr.f32.vlgmr.msra.gmra.mrb[6].mxu1 %v2063_v4  ;;  %v2709_v4 = vld [vmem:[%s4672_s5 + $0x158] sm:$0xff] }
 0x239   : > { %v1444_v17 = vpop.f32.mrb[4].mxu1 }
 0x23a   : > { %v1446_v33 = vpop.f32.mrb[5].mxu1 }
 0x25d   : > { %v1766_v29 = vpop.f32.mrb[4].mxu0 }
 0x25e   : > { %v3458_v37 = vadd.f32 %v1766_v29, %v1444_v17  ;;  %v1768_v45 = vpop.f32.mrb[5].mxu0  ;;  %v3426_v17 = vpack.c.bf16 %v2709_v4, %v2708_v62  ;;  %v2714_v29 = vld [vmem:[%s4672_s5 + $0x180] sm:$0xff] }
 0x25f   : > { %v3459_v47 = vadd.f32 %v1768_v45, %v1446_v33  ;;  %v2710_v33 = vld [vmem:[%s4672_s5 + $0x160] sm:$0xff] }
 0x260   : > { %v3429_v7 = vpack.c.bf16 %v2711_v38, %v2710_v33 }
 0x261   : > { %v1773_v6 = vmax.f32 %v3458_v37, %v3459_v47  ;;  %v3435_v37 = vpack.c.bf16 %v2715_v12, %v2714_v29  ;;  %v2716_v47 = vld [vmem:[%s4672_s5 + $0x190] sm:$0xff] }
 0x2d9   : > { %v2130_v52 = vpop.f32.mrb[6].mxu1 }
 0x2da   : > { %v2132_v63 = vpop.f32.mrb[7].mxu1 }
 0x2db   : > { %v2137_v16 = vmax.f32 %v2130_v52, %v2132_v63  ;;  %v2718_v63 = vld [vmem:[%s4672_s5 + $0x1a0] sm:$0xff] }
 0x2dd   : > { %v2138_v61 = vmax.f32 %v1773_v6, %v2137_v16  ;;  %v2717_v6 = vld [vmem:[%s4672_s5 + $0x198] sm:$0xff]  ;;  %v2719_v16 = vld [vmem:[%s4672_s5 + $0x1a8] sm:$0xff] }
 0x2de   : > { %v3438_v52 = vpack.c.bf16 %v2717_v6, %v2716_v47 }
 0x2df   : > { %v2146_v49 = vadd.f32 %v2681_v32, %v2138_v61  ;;  %v3441_v32 = vpack.c.bf16 %v2719_v16, %v2718_v63  ;;  %v2720_v61 = vld [vmem:[%s4672_s5 + $0x1b0] sm:$0xff] }
 0x2e1   : > { %v4444_v50 = vmax.f32 %v2146_v49, 0.0  ;;  %v2723_v49 = vld [vmem:[%s4672_s5 + $0x1c8] sm:$0xff] }
 0x2e3   : > { %2835 = vmatmul.mubr.f32.vlgmr.msra.gmra.mrb[6].mxu0 %v4444_v50  ;;  %v2254_v23 = vrot.slane %v4444_v50, 1  ;;  %v2344_v45 = vrot.slane %v4444_v50, 2  ;;  %v2434_v42 = vrot.slane %v4444_v50, 3 }
 0x2e4   : > { %3388 = vmatpush3.bf16.msra.mxu0 %v3387_v19  ;;  %2869 = vmatprep.mubr.msk.f32.mxu0 %vm3671_vm4, %v4719_v36  ;;  %v3447_v19 = vpack.c.bf16 %v2723_v49, %v2722_v5 }
 0x2e5   : > { %3389 = vmatprep.subr.bf16.mxu0 %v3670_v8 }
 0x2e8   : > { %3391 = vmatpush3.bf16.msra.mxu0 %v3390_v20  ;;  %v3450_v20 = vpack.c.bf16 %v2725_v40, %v2724_v11 }
 0x2e9   : > { %3392 = vmatprep.subr.bf16.mxu0 %v3670_v8 }
 0x2ec   : > { %3394 = vmatpush3.bf16.msra.mxu0 %v3393_v18  ;;  %v3453_v18 = vpack.c.bf16 %v2727_v26, %v2726_v56 }
 0x2ed   : > { %3395 = vmatprep.subr.bf16.mxu0 %v3670_v8 }
 0x2f0   : > { %3397 = vmatpush3.bf16.msra.mxu0 %v3396_v39  ;;  %v3456_v39 = vpack.c.bf16 %v2729_v30, %v2728_v28 }
 0x2f1   : > { %3398 = vmatprep.subr.bf16.mxu0 %v3670_v8 }
 0x2f4   : > { %3400 = vmatpush3.bf16.msra.mxu0 %v3399_v60 }
 0x2f5   : > { %3401 = vmatprep.subr.bf16.mxu0 %v3670_v8 }
 0x2f8   : > { %3403 = vmatpush3.bf16.msra.mxu0 %v3402_v14 }
 0x2f9   : > { %3404 = vmatprep.subr.bf16.mxu0 %v3670_v8 }
 0x2fc   : > { %3406 = vmatpush3.bf16.msra.mxu0 %v3405_v35 }
 0x2fd   : > { %3407 = vmatprep.subr.bf16.mxu0 %v3670_v8 }
 0x300   : > { %3409 = vmatpush3.bf16.msra.mxu0 %v3408_v55 }
 0x301   : > { %3410 = vmatprep.subr.bf16.mxu0 %v3670_v8 }
 0x303   : > { %2870 = vmatmul.mubr.f32.vlgmr.msra.gmra.mrb[6].mxu0 %v2254_v23 }
 0x304   : > { %3412 = vmatpush3.bf16.msra.mxu0 %v3411_v15  ;;  %2904 = vmatprep.mubr.msk.f32.mxu0 %vm3671_vm4, %v4719_v36 }
 0x305   : > { %3413 = vmatprep.subr.bf16.mxu0 %v3670_v8 }
 0x308   : > { %3415 = vmatpush3.bf16.msra.mxu0 %v3414_v53 }
 0x309   : > { %3416 = vmatprep.subr.bf16.mxu0 %v3670_v8 }
 0x30c   : > { %3418 = vmatpush3.bf16.msra.mxu0 %v3417_v46 }
 0x30d   : > { %3419 = vmatprep.subr.bf16.mxu0 %v3670_v8 }
 0x310   : > { %3421 = vmatpush3.bf16.msra.mxu0 %v3420_v22 }
 0x311   : > { %3422 = vmatprep.subr.bf16.mxu0 %v3670_v8 }
 0x314   : > { %3424 = vmatpush3.bf16.msra.mxu0 %v3423_v59 }
 0x315   : > { %3425 = vmatprep.subr.bf16.mxu0 %v3670_v8 }
 0x318   : > { %3427 = vmatpush3.bf16.msra.mxu0 %v3426_v17 }
 0x319   : > { %3428 = vmatprep.subr.bf16.mxu0 %v3670_v8 }
 0x31c   : > { %3430 = vmatpush3.bf16.msra.mxu0 %v3429_v7 }
 0x31d   : > { %3431 = vmatprep.subr.bf16.mxu0 %v3670_v8 }
 0x320   : > { %3433 = vmatpush3.bf16.msra.mxu0 %v3432_v25 }
 0x321   : > { %3434 = vmatprep.subr.bf16.mxu0 %v3670_v8 }
 0x323   : > { %2905 = vmatmul.mubr.f32.vlgmr.msra.gmra.mrb[6].mxu0 %v2344_v45 }
 0x324   : > { %3436 = vmatpush3.bf16.msra.mxu0 %v3435_v37  ;;  %2939 = vmatprep.mubr.msk.f32.mxu0 %vm3671_vm4, %v4719_v36  ;;  %v2721_v36 = vld [vmem:[%s4672_s5 + $0x1b8] sm:$0xff] }
 0x325   : > { %3437 = vmatprep.subr.bf16.mxu0 %v3670_v8  ;;  %v3444_v57 = vpack.c.bf16 %v2721_v36, %v2720_v61 }
 0x328   : > { %3439 = vmatpush3.bf16.msra.mxu0 %v3438_v52 }
 0x329   : > { %3440 = vmatprep.subr.bf16.mxu0 %v3670_v8 }
 0x32c   : > { %3442 = vmatpush3.bf16.msra.mxu0 %v3441_v32 }
 0x32d   : > { %3443 = vmatprep.subr.bf16.mxu0 %v3670_v8 }
 0x330   : > { %3445 = vmatpush3.bf16.msra.mxu0 %v3444_v57 }
 0x331   : > { %3446 = vmatprep.subr.bf16.mxu0 %v3670_v8 }
 0x334   : > { %3448 = vmatpush3.bf16.msra.mxu0 %v3447_v19 }
 0x335   : > { %3449 = vmatprep.subr.bf16.mxu0 %v3670_v8 }
 0x338   : > { %3451 = vmatpush3.bf16.msra.mxu0 %v3450_v20 }
 0x339   : > { %3452 = vmatprep.subr.bf16.mxu0 %v3670_v8 }
 0x33c   : > { %3454 = vmatpush3.bf16.msra.mxu0 %v3453_v18 }
 0x33d   : > { %3455 = vmatprep.subr.bf16.mxu0 %v3670_v8 }
 0x340   : > { %3457 = vmatpush3.bf16.msra.mxu0 %v3456_v39 }
 0x343   : > { %2940 = vmatmul.mubr.f32.vlgmr.msra.gmra.mrb[6].mxu0 %v2434_v42 }
 0x416   : > { %v2502_v60 = vpop.f32.mrb[6].mxu0 }
 0x417   : > { %v3460_v1 = vadd.f32 %v2502_v60, %v2148_v48  ;;  %v2941_v9 = vpop.f32.mrb[7].mxu0 }
 0x419   : > { %2508 = vst.msk [vmem:[%s285_s18] sm:$0x1] %vm2507_vm5, %v3460_v1 }
 0x41a   : > { %3610 = shalt.err (!%p3607_p7)
}
 0x41b   : > { %s3611_s29 = scalar_lea.hbm %s4625_s8, 16  ;;  %s3615_s17 = scalar_lea.hbm %s4674_s7, 32 }
 0x41c   : > { %p3612_p8 = scmp.ne.s32.totalorder %s4625_s8, %s3611_s29  ;;  %p3616_p1 = scmp.lt.u32.totalorder %s4625_s8, %s4674_s7 }
 0x41d   : > { %p3617_p0 = scmp.lt.u32.totalorder %s3615_s17, %s3611_s29  ;;  %p3619_p6 = scmp.lt.u32.totalorder %s3611_s29, %s4625_s8 }
 0x41e   : > { %p3613_p11 = pnand %p3612_p8, %p4735_p9 }
 0x41f   : > { %p3618_p5 = por %p3617_p0, %p3616_p1 }
 0x420   : > { %p3614_p13 = pneg %p3613_p11 }
 0x421   : > { %p3620_p10 = por %p3619_p6, %p3618_p5 }
 0x423   : > { %p3621_p12 = pnand %p3620_p10, %p3614_p13 }
 0x425   : > { %3624 = shalt.err (!%p3621_p12)
}
 0x426   : > { %3517 = dma.vmem_to_hbm [thread:$0]  (%p4735_p9), %s4627_s13, 16, %s4625_s8, %s2510_s19  }
 0x427 PF: > { %p3529_p2 = scmp.ge.s32.totalorder %s3663_s27, 2  ;;  %s2534_s20 = sand.u32 1, %s3651_s24  }
 0x428   : > { %p4736_p3 = scmp.ne.s32.totalorder %s4696_s12, 0  ;;  %s2535_s21 = scalar_lea.sflag [#allocation5], %s2534_s20 }
 0x42a   : > { %p3524_p4 = pnand %p3529_p2, %p4736_p3 }
 0x42c   : > { %3646 = dma.done.wait (!%p3524_p4), %s2535_s21, 16  }
 0x42d   : > { %3648 = vsyncadd (!%p3524_p4), %s2535_s21, 4294967280  ;;  %p18_p7 = scmp.ge.s32.totalorder %s3738_s30, 4   ;;  %s4737_s24 = smov %s3655_s25 }
 0x42e   : > { %s4738_s25 = smov %s3659_s26  ;;  %s4739_s26 = smov %s3749_s10 }
 0x42f   : > { %s4740_s27 = smov %s3738_s30  ;;  %20 = sbr.rel (!%p18_p7) target bundleno = 4 (0x4), region = 115 }
 0x436   :  { %2539 = vsyncpa [#allocation4], 1 }
 0x437   :  { %2541 = vsyncpa [#allocation4 + $0x1], 1 }
 0x438   :  { %2542 = vsyncpa [#allocation5], 1 }
 0x439   :  { %2544 = vsyncpa [#allocation5 + $0x1], 1 }

</bundles_post_ra>
